<compile_context>
chip_gen: v6e
topology: v6e:2x2x1
jax: 0.10.0
libtpu: 0.0.40
codegen_flags: <defaults>
</compile_context>

<pallas_src>
import functools
import math

import jax
import jax.numpy as jnp
from jax.experimental import pallas as pl
from jax.experimental.pallas import tpu as pltpu

_LN_EPS = 1e-5
_NEG_INF = -1e30


# ----------------------------------------------------------------------------
# In-kernel helpers (operate on VMEM-resident values)
# ----------------------------------------------------------------------------

def _mm(a, w):
    """MXU matmul: bf16 operands, f32 accumulation."""
    return jnp.dot(a.astype(jnp.bfloat16), w.astype(jnp.bfloat16),
                   preferred_element_type=jnp.float32)


def _ln(x, g, b):
    """LayerNorm over the last dim (f32 VPU path)."""
    mean = jnp.mean(x, axis=-1, keepdims=True)
    xc = x - mean
    var = jnp.mean(xc * xc, axis=-1, keepdims=True)
    return xc * jax.lax.rsqrt(var + _LN_EPS) * g + b


def _erf(x):
    # Abramowitz & Stegun 7.1.26 (|err| < 1.5e-7): matches open_clip's exact-erf
    # nn.GELU using only basic VPU/EUP ops.
    a1, a2, a3, a4, a5 = 0.254829592, -0.284496736, 1.421413741, -1.453152027, 1.061405429
    pp = 0.3275911
    ax = jnp.abs(x)
    t = 1.0 / (1.0 + pp * ax)
    poly = ((((a5 * t + a4) * t + a3) * t + a2) * t + a1) * t
    y = 1.0 - poly * jnp.exp(-ax * ax)
    return jnp.where(x >= 0.0, y, -y)


def _gelu(x):
    return 0.5 * x * (1.0 + _erf(x * (1.0 / math.sqrt(2.0))))


def _resblock(x, ln1_g, ln1_b, w_qkv, b_qkv, w_out, b_out, ln2_g, ln2_b,
              w_fc, b_fc, w_proj, b_proj, *, H, causal):
    """One pre-LN transformer block on a single example's (T, D) residual."""
    T, D = x.shape
    d = D // H
    scale = 1.0 / math.sqrt(d)

    h1 = _ln(x, ln1_g, ln1_b)
    qkv = _mm(h1, w_qkv) + b_qkv                       # (T, 3D), one lane-dense matmul

    if causal:
        ridx = jax.lax.broadcasted_iota(jnp.int32, (T, T), 0)
        cidx = jax.lax.broadcasted_iota(jnp.int32, (T, T), 1)
        bias = jnp.where(cidx <= ridx, 0.0, _NEG_INF).astype(jnp.float32)

    # TODO(synk): at real head dims process heads in 128-lane groups so Q/K/V
    # slices start on full lane-tile boundaries.
    heads = []
    for hh in range(H):
        q = (qkv[:, hh * d:(hh + 1) * d] * scale).astype(jnp.bfloat16)   # scale folded into q
        k = qkv[:, D + hh * d:D + (hh + 1) * d].astype(jnp.bfloat16)
        v = qkv[:, 2 * D + hh * d:2 * D + (hh + 1) * d].astype(jnp.bfloat16)
        # q @ k^T via dot_general (no explicit XLU transpose of K).
        s = jax.lax.dot_general(q, k, (((1,), (1,)), ((), ())),
                                preferred_element_type=jnp.float32)       # (T, T)
        if causal:
            s = s + bias
        s = s - jnp.max(s, axis=-1, keepdims=True)
        p = jnp.exp(s)
        inv_l = pl.reciprocal(jnp.sum(p, axis=-1, keepdims=True), approx=True)
        heads.append(jnp.dot(p.astype(jnp.bfloat16), v,
                             preferred_element_type=jnp.float32) * inv_l)  # (T, d)

    o_cat = jnp.concatenate(heads, axis=-1)             # (T, D) lane-concatenate
    x = x + _mm(o_cat, w_out) + b_out                   # one dense (T,D)@(D,D) out-proj

    h2 = _ln(x, ln2_g, ln2_b)
    h2 = _gelu(_mm(h2, w_fc) + b_fc)
    return x + _mm(h2, w_proj) + b_proj


def _pool_head(pooled, lnf_g, lnf_b, w_head, o_ref):
    """Final LN -> projection (no bias) -> L2-normalize -> write (1, E)."""
    pooled = _ln(pooled, lnf_g, lnf_b)
    f = _mm(pooled, w_head)
    nsq = jnp.sum(f * f, axis=-1, keepdims=True)
    o_ref[...] = f * jax.lax.rsqrt(nsq + 1e-12)


# ----------------------------------------------------------------------------
# Kernels: grid = (batch, layer), residual in persistent VMEM scratch
# ----------------------------------------------------------------------------

def _vision_kernel(patches_ref, patch_w_ref, stem_bias_ref, ln_pre_g, ln_pre_b,
                   ln1_g, ln1_b, w_qkv, b_qkv, w_out, b_out, ln2_g, ln2_b,
                   w_fc, b_fc, w_proj, b_proj, ln_post_g, ln_post_b, proj,
                   o_ref, x_scratch, *, H, L):
    l = pl.program_id(1)

    @pl.when(l == 0)
    def _():
        # Patch-embed stem: cls/pos folded into a (T, D) per-row bias.
        x0 = _mm(patches_ref[...], patch_w_ref[...]) + stem_bias_ref[...]
        x_scratch[...] = _ln(x0, ln_pre_g[...], ln_pre_b[...])

    x = _resblock(x_scratch[...],
                  ln1_g[...], ln1_b[...], w_qkv[...], b_qkv[...],
                  w_out[...], b_out[...], ln2_g[...], ln2_b[...],
                  w_fc[...], b_fc[...], w_proj[...], b_proj[...],
                  H=H, causal=False)
    x_scratch[...] = x

    @pl.when(l == L - 1)
    def _():
        _pool_head(x[0:1, :], ln_post_g[...], ln_post_b[...], proj[...], o_ref)


def _text_kernel(eot_ref, x0_ref,
                 ln1_g, ln1_b, w_qkv, b_qkv, w_out, b_out, ln2_g, ln2_b,
                 w_fc, b_fc, w_proj, b_proj, ln_final_g, ln_final_b, proj,
                 o_ref, x_scratch, *, H, L):
    b = pl.program_id(0)
    l = pl.program_id(1)

    @pl.when(l == 0)
    def _():
        x_scratch[...] = x0_ref[...]

    x = _resblock(x_scratch[...],
                  ln1_g[...], ln1_b[...], w_qkv[...], b_qkv[...],
                  w_out[...], b_out[...], ln2_g[...], ln2_b[...],
                  w_fc[...], b_fc[...], w_proj[...], b_proj[...],
                  H=H, causal=True)
    x_scratch[...] = x

    @pl.when(l == L - 1)
    def _():
        eot = eot_ref[b]                                      # scalar-prefetched EOT index
        _pool_head(x_scratch[pl.ds(eot, 1), :],
                   ln_final_g[...], ln_final_b[...], proj[...], o_ref)


# ----------------------------------------------------------------------------
# BlockSpec builders & pallas_call wrapper
# ----------------------------------------------------------------------------

def _full_spec(shape):
    nd = len(shape)
    return pl.BlockSpec(tuple(shape), lambda b, l, *_: (0,) * nd)


def _batch_spec(tail_shape):
    nt = len(tail_shape)
    return pl.BlockSpec((pl.Squeezed(),) + tuple(tail_shape),
                        lambda b, l, *_: (b,) + (0,) * nt)


def _layer_spec(tail_shape):
    nt = len(tail_shape)
    return pl.BlockSpec((pl.Squeezed(),) + tuple(tail_shape),
                        lambda b, l, *_: (l,) + (0,) * nt)


def _block_specs(w):
    """BlockSpecs for the per-layer (L-stacked) transformer block params."""
    return [
        _layer_spec((1, w)), _layer_spec((1, w)),             # ln1 g/b
        _layer_spec((w, 3 * w)), _layer_spec((1, 3 * w)),     # qkv
        _layer_spec((w, w)), _layer_spec((1, w)),             # out proj
        _layer_spec((1, w)), _layer_spec((1, w)),             # ln2 g/b
        _layer_spec((w, 4 * w)), _layer_spec((1, 4 * w)),     # mlp fc
        _layer_spec((4 * w, w)), _layer_spec((1, w)),         # mlp proj
    ]


def _cost_estimate(args, out_shape, *, B, T, D, H, L, E, P=None):
    d = D // H
    flops = 0
    if P is not None:
        flops += 2 * B * T * P * D                            # patch-embed stem
    per_layer = (2 * T * D * 3 * D) + H * (2 * T * T * d) * 2 \
                + (2 * T * D * D) + 2 * (2 * T * D * 4 * D)
    flops += B * L * per_layer
    flops += 2 * B * D * E
    trans = B * L * (H * T * T + T * 4 * D)                   # softmax exp + gelu exp
    bytes_accessed = sum(int(a.size) * a.dtype.itemsize for a in args)
    bytes_accessed += math.prod(out_shape) * 4
    return pl.CostEstimate(flops=int(flops), transcendentals=int(trans),
                           bytes_accessed=int(bytes_accessed))


def _run_tower(kernel, scalar_args, args, in_specs, B, L, E, seq, width, cost):
    out = pl.pallas_call(
        kernel,
        out_shape=jax.ShapeDtypeStruct((B, 1, E), jnp.float32),
        grid_spec=pltpu.PrefetchScalarGridSpec(
            num_scalar_prefetch=len(scalar_args),
            grid=(B, L),
            in_specs=in_specs,
            out_specs=pl.BlockSpec((pl.Squeezed(), 1, E), lambda b, l, *_: (b, 0, 0)),
            scratch_shapes=[pltpu.VMEM((seq, width), jnp.float32)]),
        compiler_params=pltpu.CompilerParams(
            dimension_semantics=("parallel", "arbitrary"),
            vmem_limit_bytes=32 * 1024 * 1024),
        cost_estimate=cost,
    )(*scalar_args, *args)
    return out.reshape(B, E)


# ----------------------------------------------------------------------------
# Model wrappers (JAX glue: layout plumbing + gathers only)
# ----------------------------------------------------------------------------

def encode_image(image, p, cfg):
    B, C, Hi, Wi = image.shape
    ps = cfg["patch"]
    D, E = cfg["vision_width"], cfg["embed_dim"]
    H, L = cfg["vision_heads"], cfg["vision_layers"]
    nH, nW = Hi // ps, Wi // ps
    nP = nH * nW
    T = nP + 1
    P = C * ps * ps

    # stride=ps "conv" as patch extraction (NCHW, (c, ph, pw) flattening order,
    # matching a flattened PyTorch conv weight) -- pure layout glue in XLA.
    patches = image.reshape(B, C, nH, ps, nW, ps)
    patches = patches.transpose(0, 2, 4, 1, 3, 5).reshape(B, nP, P)
    # all-zero row per image for the cls-token slot -> stem is one matmul + bias.
    patches = jnp.concatenate([jnp.zeros((B, 1, P), jnp.float32), patches], axis=1)

    # folded (T, D) stem bias: row 0 = cls + pos[0]; rows i>0 = patch_b + pos[i]
    stem_bias = p["pos"] + p["patch_b"]
    stem_bias = stem_bias.at[0:1].set(p["pos"][0:1] + p["cls"])

    bf16 = jnp.bfloat16
    blk = p["blk"]
    blk_args = (blk["ln1_g"], blk["ln1_b"],
                blk["w_qkv"].astype(bf16), blk["b_qkv"],
                blk["w_out"].astype(bf16), blk["b_out"],
                blk["ln2_g"], blk["ln2_b"],
                blk["w_fc"].astype(bf16), blk["b_fc"],
                blk["w_proj"].astype(bf16), blk["b_proj"])
    args = (patches, p["patch_w"].astype(bf16), stem_bias,
            p["ln_pre_g"], p["ln_pre_b"],
            *blk_args,
            p["ln_post_g"], p["ln_post_b"], p["proj"].astype(bf16))

    in_specs = ([_batch_spec((T, P)), _full_spec((P, D)), _full_spec((T, D)),
                 _full_spec((1, D)), _full_spec((1, D))]
                + _block_specs(D)
                + [_full_spec((1, D)), _full_spec((1, D)), _full_spec((D, E))])

    cost = _cost_estimate(args, (B, 1, E), B=B, T=T, D=D, H=H, L=L, E=E, P=P)
    kernel = functools.partial(_vision_kernel, H=H, L=L)
    return _run_tower(kernel, (), args, in_specs, B, L, E, T, D, cost)


def encode_text(text, p, cfg):
    B, T = text.shape
    Dt, E = cfg["text_width"], cfg["embed_dim"]
    H, L = cfg["text_heads"], cfg["text_layers"]

    # TODO(synk): token-embedding lookup is a data-dependent gather; kept as XLA glue.
    x0 = (jnp.take(p["tok_emb"], text, axis=0) + p["pos"][None]).astype(jnp.float32)
    # EOT pooling index (OpenCLIP convention: EOT token has the largest id).
    eot = jnp.argmax(text, axis=-1).astype(jnp.int32)

    bf16 = jnp.bfloat16
    blk = p["blk"]
    blk_args = (blk["ln1_g"], blk["ln1_b"],
                blk["w_qkv"].astype(bf16), blk["b_qkv"],
                blk["w_out"].astype(bf16), blk["b_out"],
                blk["ln2_g"], blk["ln2_b"],
                blk["w_fc"].astype(bf16), blk["b_fc"],
                blk["w_proj"].astype(bf16), blk["b_proj"])
    args = (x0, *blk_args, p["ln_final_g"], p["ln_final_b"], p["text_proj"].astype(bf16))

    in_specs = ([_batch_spec((T, Dt))]
                + _block_specs(Dt)
                + [_full_spec((1, Dt)), _full_spec((1, Dt)), _full_spec((Dt, E))])

    cost = _cost_estimate(args, (B, 1, E), B=B, T=T, D=Dt, H=H, L=L, E=E, P=None)
    kernel = functools.partial(_text_kernel, H=H, L=L)
    return _run_tower(kernel, (eot,), args, in_specs, B, L, E, T, Dt, cost)


def clip_forward(params, image, text, cfg):
    # OpenClipWrapper.forward -> inner CLIP forward:
    # returns (image_features, text_features, logit_scale.exp())
    img_f = encode_image(image, params["visual"], cfg)
    txt_f = encode_text(text, params["text"], cfg)
    return img_f, txt_f, jnp.exp(params["logit_scale"])


# ----------------------------------------------------------------------------
# Deterministic parameter init (block params stacked along a leading layer dim)
# ----------------------------------------------------------------------------

def init_params(key, cfg):
    D, Dt, E = cfg["vision_width"], cfg["text_width"], cfg["embed_dim"]
    C, ps = cfg["image_channels"], cfg["patch"]
    n_patches = (cfg["image_size"] // ps) ** 2
    keys = iter(jax.random.split(key, 64))
    nrm = lambda shape, std=0.02: jax.random.normal(next(keys), shape, jnp.float32) * std

    def blocks(w, L):
        return dict(
            ln1_g=jnp.ones((L, 1, w), jnp.float32), ln1_b=jnp.zeros((L, 1, w), jnp.float32),
            w_qkv=nrm((L, w, 3 * w)), b_qkv=jnp.zeros((L, 1, 3 * w), jnp.float32),
            w_out=nrm((L, w, w)), b_out=jnp.zeros((L, 1, w), jnp.float32),
            ln2_g=jnp.ones((L, 1, w), jnp.float32), ln2_b=jnp.zeros((L, 1, w), jnp.float32),
            w_fc=nrm((L, w, 4 * w)), b_fc=jnp.zeros((L, 1, 4 * w), jnp.float32),
            w_proj=nrm((L, 4 * w, w)), b_proj=jnp.zeros((L, 1, w), jnp.float32),
        )

    visual = dict(
        patch_w=nrm((C * ps * ps, D)),                  # flattened conv weight
        patch_b=jnp.zeros((1, D), jnp.float32),         # CLIP patch conv has no bias
        cls=nrm((1, D)),
        pos=nrm((n_patches + 1, D)),
        ln_pre_g=jnp.ones((1, D), jnp.float32), ln_pre_b=jnp.zeros((1, D), jnp.float32),
        blk=blocks(D, cfg["vision_layers"]),
        ln_post_g=jnp.ones((1, D), jnp.float32), ln_post_b=jnp.zeros((1, D), jnp.float32),
        proj=nrm((D, E)),
    )
    textp = dict(
        tok_emb=nrm((cfg["vocab"], Dt)),
        pos=nrm((cfg["context"], Dt)),
        blk=blocks(Dt, cfg["text_layers"]),
        ln_final_g=jnp.ones((1, Dt), jnp.float32), ln_final_b=jnp.zeros((1, Dt), jnp.float32),
        text_proj=nrm((Dt, E)),
    )
    return dict(visual=visual, text=textp,
                logit_scale=jnp.asarray(math.log(1.0 / 0.07), jnp.float32))


# ----------------------------------------------------------------------------
# Main
# ----------------------------------------------------------------------------

if __name__ == "__main__":
    cfg = dict(
        image_size=16, image_channels=3, patch=8,
        vision_width=32, vision_heads=2, vision_layers=2,
        vocab=64, context=8, text_width=32, text_heads=2, text_layers=2,
        embed_dim=32,
    )
    key = jax.random.PRNGKey(0)
    kp, ki, kt = jax.random.split(key, 3)
    params = init_params(kp, cfg)

    image = jax.random.normal(ki, (2, 3, 16, 16), jnp.float32)      # NCHW
    text = jax.random.randint(kt, (2, cfg["context"]), 1, cfg["vocab"] - 1)
    text = text.at[:, -1].set(cfg["vocab"] - 1)                     # EOT (max token) last

    fwd = jax.jit(functools.partial(clip_forward, cfg=cfg))
    img_f, txt_f, logit_scale = fwd(params, image, text)
    jax.block_until_ready((img_f, txt_f, logit_scale))

    assert img_f.shape == (2, cfg["embed_dim"])
    assert txt_f.shape == (2, cfg["embed_dim"])
    assert jnp.all(jnp.isfinite(img_f)) and jnp.all(jnp.isfinite(txt_f))
    assert jnp.allclose(jnp.sum(img_f * img_f, -1), 1.0, atol=1e-3)
    assert jnp.allclose(jnp.sum(txt_f * txt_f, -1), 1.0, atol=1e-3)
    print("KERNEL_OK")
</pallas_src>

<mosaic_0001>
module attributes {stable_mosaic.version = 11 : i64} {
  func.func @_vision_kernel(%arg0: i32, %arg1: i32, %arg2: memref<1x5x192xf32, #tpu.memory_space<vmem>>, %arg3: memref<192x32xbf16, #tpu.memory_space<vmem>>, %arg4: memref<5x32xf32, #tpu.memory_space<vmem>>, %arg5: memref<1x32xf32, #tpu.memory_space<vmem>>, %arg6: memref<1x32xf32, #tpu.memory_space<vmem>>, %arg7: memref<1x1x32xf32, #tpu.memory_space<vmem>>, %arg8: memref<1x1x32xf32, #tpu.memory_space<vmem>>, %arg9: memref<1x32x96xbf16, #tpu.memory_space<vmem>>, %arg10: memref<1x1x96xf32, #tpu.memory_space<vmem>>, %arg11: memref<1x32x32xbf16, #tpu.memory_space<vmem>>, %arg12: memref<1x1x32xf32, #tpu.memory_space<vmem>>, %arg13: memref<1x1x32xf32, #tpu.memory_space<vmem>>, %arg14: memref<1x1x32xf32, #tpu.memory_space<vmem>>, %arg15: memref<1x32x128xbf16, #tpu.memory_space<vmem>>, %arg16: memref<1x1x128xf32, #tpu.memory_space<vmem>>, %arg17: memref<1x128x32xbf16, #tpu.memory_space<vmem>>, %arg18: memref<1x1x32xf32, #tpu.memory_space<vmem>>, %arg19: memref<1x32xf32, #tpu.memory_space<vmem>>, %arg20: memref<1x32xf32, #tpu.memory_space<vmem>>, %arg21: memref<32x32xbf16, #tpu.memory_space<vmem>>, %arg22: memref<1x1x32xf32, #tpu.memory_space<vmem>>, %arg23: memref<5x32xf32, #tpu.memory_space<vmem>>) attributes {dimension_semantics = [#tpu.dimension_semantics<parallel>, #tpu.dimension_semantics<arbitrary>], iteration_bounds = array<i64: 2, 2>, scalar_prefetch = 0 : i64, scratch_operands = 1 : i64, tpu.core_type = #tpu.core_type<tc>, window_params = [{transform_indices = @transform_0, window_bounds = array<i64: 1, 5, 192>}, {pipeline_mode = #tpu.pipeline_mode<synchronous>, transform_indices = @transform_1, window_bounds = array<i64: 192, 32>}, {pipeline_mode = #tpu.pipeline_mode<synchronous>, transform_indices = @transform_2, window_bounds = array<i64: 5, 32>}, {pipeline_mode = #tpu.pipeline_mode<synchronous>, transform_indices = @transform_3, window_bounds = array<i64: 1, 32>}, {pipeline_mode = #tpu.pipeline_mode<synchronous>, transform_indices = @transform_4, window_bounds = array<i64: 1, 32>}, {transform_indices = @transform_5, window_bounds = array<i64: 1, 1, 32>}, {transform_indices = @transform_6, window_bounds = array<i64: 1, 1, 32>}, {transform_indices = @transform_7, window_bounds = array<i64: 1, 32, 96>}, {transform_indices = @transform_8, window_bounds = array<i64: 1, 1, 96>}, {transform_indices = @transform_9, window_bounds = array<i64: 1, 32, 32>}, {transform_indices = @transform_10, window_bounds = array<i64: 1, 1, 32>}, {transform_indices = @transform_11, window_bounds = array<i64: 1, 1, 32>}, {transform_indices = @transform_12, window_bounds = array<i64: 1, 1, 32>}, {transform_indices = @transform_13, window_bounds = array<i64: 1, 32, 128>}, {transform_indices = @transform_14, window_bounds = array<i64: 1, 1, 128>}, {transform_indices = @transform_15, window_bounds = array<i64: 1, 128, 32>}, {transform_indices = @transform_16, window_bounds = array<i64: 1, 1, 32>}, {pipeline_mode = #tpu.pipeline_mode<synchronous>, transform_indices = @transform_17, window_bounds = array<i64: 1, 32>}, {pipeline_mode = #tpu.pipeline_mode<synchronous>, transform_indices = @transform_18, window_bounds = array<i64: 1, 32>}, {pipeline_mode = #tpu.pipeline_mode<synchronous>, transform_indices = @transform_19, window_bounds = array<i64: 32, 32>}, {transform_indices = @transform_20, window_bounds = array<i64: 1, 1, 32>}]} {
    %c0_i32 = arith.constant 0 : i32
    %0 = arith.cmpi eq, %arg1, %c0_i32 : i32
    %1 = arith.extui %0 : i1 to i32
    %c0_i32_0 = arith.constant 0 : i32
    %2 = arith.cmpi ne, %1, %c0_i32_0 : i32
    scf.if %2 {
      %c0_79 = arith.constant 0 : index
      %c0_80 = arith.constant 0 : index
      %c0_81 = arith.constant 0 : index
      %173 = vector.load %arg2[%c0_79, %c0_80, %c0_81] : memref<1x5x192xf32, #tpu.memory_space<vmem>>, vector<1x5x192xf32>
      %174 = vector.shape_cast %173 : vector<1x5x192xf32> to vector<5x192xf32>
      %c0_82 = arith.constant 0 : index
      %c0_83 = arith.constant 0 : index
      %175 = vector.load %arg3[%c0_82, %c0_83] : memref<192x32xbf16, #tpu.memory_space<vmem>>, vector<192x32xbf16>
      %176 = arith.truncf %174 : vector<5x192xf32> to vector<5x192xbf16>
      %cst_84 = arith.constant dense<0.000000e+00> : vector<5x32xf32>
      %177 = tpu.matmul %176, %175, %cst_84 {dimension_numbers = #tpu.dot_dimension_numbers<[1], [0], [0], [1], [0, 0, 1, 1], [], []>} : vector<5x192xbf16>, vector<192x32xbf16>, vector<5x32xf32> -> vector<5x32xf32>
      %c0_85 = arith.constant 0 : index
      %c0_86 = arith.constant 0 : index
      %178 = vector.load %arg4[%c0_85, %c0_86] : memref<5x32xf32, #tpu.memory_space<vmem>>, vector<5x32xf32>
      %179 = arith.addf %177, %178 : vector<5x32xf32>
      %c0_87 = arith.constant 0 : index
      %c0_88 = arith.constant 0 : index
      %180 = vector.load %arg5[%c0_87, %c0_88] : memref<1x32xf32, #tpu.memory_space<vmem>>, vector<1x32xf32>
      %c0_89 = arith.constant 0 : index
      %c0_90 = arith.constant 0 : index
      %181 = vector.load %arg6[%c0_89, %c0_90] : memref<1x32xf32, #tpu.memory_space<vmem>>, vector<1x32xf32>
      %cst_91 = arith.constant dense<0.000000e+00> : vector<5xf32>
      %182 = vector.multi_reduction <add>, %179, %cst_91 [1] : vector<5x32xf32> to vector<5xf32>
      %183 = vector.shape_cast %182 : vector<5xf32> to vector<5x1xf32>
      %cst_92 = arith.constant 3.200000e+01 : f32
      %184 = vector.broadcast %cst_92 : f32 to vector<5x1xf32>
      %185 = arith.divf %183, %184 : vector<5x1xf32>
      %186 = vector.broadcast %185 : vector<5x1xf32> to vector<5x32xf32>
      %187 = arith.subf %179, %186 : vector<5x32xf32>
      %188 = arith.mulf %187, %187 : vector<5x32xf32>
      %cst_93 = arith.constant dense<0.000000e+00> : vector<5xf32>
      %189 = vector.multi_reduction <add>, %188, %cst_93 [1] : vector<5x32xf32> to vector<5xf32>
      %190 = vector.shape_cast %189 : vector<5xf32> to vector<5x1xf32>
      %cst_94 = arith.constant 3.200000e+01 : f32
      %191 = vector.broadcast %cst_94 : f32 to vector<5x1xf32>
      %192 = arith.divf %190, %191 : vector<5x1xf32>
      %cst_95 = arith.constant 9.99999974E-6 : f32
      %193 = vector.broadcast %cst_95 : f32 to vector<5x1xf32>
      %194 = arith.addf %192, %193 : vector<5x1xf32>
      %195 = math.rsqrt %194 : vector<5x1xf32>
      %196 = vector.broadcast %195 : vector<5x1xf32> to vector<5x32xf32>
      %197 = arith.mulf %187, %196 : vector<5x32xf32>
      %198 = vector.broadcast %180 : vector<1x32xf32> to vector<5x32xf32>
      %199 = arith.mulf %197, %198 : vector<5x32xf32>
      %200 = vector.broadcast %181 : vector<1x32xf32> to vector<5x32xf32>
      %201 = arith.addf %199, %200 : vector<5x32xf32>
      %c0_96 = arith.constant 0 : index
      %c0_97 = arith.constant 0 : index
      %202 = vector.load %arg23[%c0_96, %c0_97] : memref<5x32xf32, #tpu.memory_space<vmem>>, vector<5x32xf32>
      tpu.vector_store %arg23[%c0_96, %c0_97], %201 {strides = array<i32>} : memref<5x32xf32, #tpu.memory_space<vmem>>, vector<5x32xf32>,
    } else {
    }
    %c0 = arith.constant 0 : index
    %c0_1 = arith.constant 0 : index
    %3 = vector.load %arg23[%c0, %c0_1] : memref<5x32xf32, #tpu.memory_space<vmem>>, vector<5x32xf32>
    %c0_2 = arith.constant 0 : index
    %c0_3 = arith.constant 0 : index
    %c0_4 = arith.constant 0 : index
    %4 = vector.load %arg7[%c0_2, %c0_3, %c0_4] : memref<1x1x32xf32, #tpu.memory_space<vmem>>, vector<1x1x32xf32>
    %5 = vector.shape_cast %4 : vector<1x1x32xf32> to vector<1x32xf32>
    %c0_5 = arith.constant 0 : index
    %c0_6 = arith.constant 0 : index
    %c0_7 = arith.constant 0 : index
    %6 = vector.load %arg8[%c0_5, %c0_6, %c0_7] : memref<1x1x32xf32, #tpu.memory_space<vmem>>, vector<1x1x32xf32>
    %7 = vector.shape_cast %6 : vector<1x1x32xf32> to vector<1x32xf32>
    %c0_8 = arith.constant 0 : index
    %c0_9 = arith.constant 0 : index
    %c0_10 = arith.constant 0 : index
    %8 = vector.load %arg9[%c0_8, %c0_9, %c0_10] : memref<1x32x96xbf16, #tpu.memory_space<vmem>>, vector<1x32x96xbf16>
    %9 = vector.shape_cast %8 : vector<1x32x96xbf16> to vector<32x96xbf16>
    %c0_11 = arith.constant 0 : index
    %c0_12 = arith.constant 0 : index
    %c0_13 = arith.constant 0 : index
    %10 = vector.load %arg10[%c0_11, %c0_12, %c0_13] : memref<1x1x96xf32, #tpu.memory_space<vmem>>, vector<1x1x96xf32>
    %11 = vector.shape_cast %10 : vector<1x1x96xf32> to vector<1x96xf32>
    %c0_14 = arith.constant 0 : index
    %c0_15 = arith.constant 0 : index
    %c0_16 = arith.constant 0 : index
    %12 = vector.load %arg11[%c0_14, %c0_15, %c0_16] : memref<1x32x32xbf16, #tpu.memory_space<vmem>>, vector<1x32x32xbf16>
    %13 = vector.shape_cast %12 : vector<1x32x32xbf16> to vector<32x32xbf16>
    %c0_17 = arith.constant 0 : index
    %c0_18 = arith.constant 0 : index
    %c0_19 = arith.constant 0 : index
    %14 = vector.load %arg12[%c0_17, %c0_18, %c0_19] : memref<1x1x32xf32, #tpu.memory_space<vmem>>, vector<1x1x32xf32>
    %15 = vector.shape_cast %14 : vector<1x1x32xf32> to vector<1x32xf32>
    %c0_20 = arith.constant 0 : index
    %c0_21 = arith.constant 0 : index
    %c0_22 = arith.constant 0 : index
    %16 = vector.load %arg13[%c0_20, %c0_21, %c0_22] : memref<1x1x32xf32, #tpu.memory_space<vmem>>, vector<1x1x32xf32>
    %17 = vector.shape_cast %16 : vector<1x1x32xf32> to vector<1x32xf32>
    %c0_23 = arith.constant 0 : index
    %c0_24 = arith.constant 0 : index
    %c0_25 = arith.constant 0 : index
    %18 = vector.load %arg14[%c0_23, %c0_24, %c0_25] : memref<1x1x32xf32, #tpu.memory_space<vmem>>, vector<1x1x32xf32>
    %19 = vector.shape_cast %18 : vector<1x1x32xf32> to vector<1x32xf32>
    %c0_26 = arith.constant 0 : index
    %c0_27 = arith.constant 0 : index
    %c0_28 = arith.constant 0 : index
    %20 = vector.load %arg15[%c0_26, %c0_27, %c0_28] : memref<1x32x128xbf16, #tpu.memory_space<vmem>>, vector<1x32x128xbf16>
    %21 = vector.shape_cast %20 : vector<1x32x128xbf16> to vector<32x128xbf16>
    %c0_29 = arith.constant 0 : index
    %c0_30 = arith.constant 0 : index
    %c0_31 = arith.constant 0 : index
    %22 = vector.load %arg16[%c0_29, %c0_30, %c0_31] : memref<1x1x128xf32, #tpu.memory_space<vmem>>, vector<1x1x128xf32>
    %23 = vector.shape_cast %22 : vector<1x1x128xf32> to vector<1x128xf32>
    %c0_32 = arith.constant 0 : index
    %c0_33 = arith.constant 0 : index
    %c0_34 = arith.constant 0 : index
    %24 = vector.load %arg17[%c0_32, %c0_33, %c0_34] : memref<1x128x32xbf16, #tpu.memory_space<vmem>>, vector<1x128x32xbf16>
    %25 = vector.shape_cast %24 : vector<1x128x32xbf16> to vector<128x32xbf16>
    %c0_35 = arith.constant 0 : index
    %c0_36 = arith.constant 0 : index
    %c0_37 = arith.constant 0 : index
    %26 = vector.load %arg18[%c0_35, %c0_36, %c0_37] : memref<1x1x32xf32, #tpu.memory_space<vmem>>, vector<1x1x32xf32>
    %27 = vector.shape_cast %26 : vector<1x1x32xf32> to vector<1x32xf32>
    %cst = arith.constant dense<0.000000e+00> : vector<5xf32>
    %28 = vector.multi_reduction <add>, %3, %cst [1] : vector<5x32xf32> to vector<5xf32>
    %29 = vector.shape_cast %28 : vector<5xf32> to vector<5x1xf32>
    %cst_38 = arith.constant 3.200000e+01 : f32
    %30 = vector.broadcast %cst_38 : f32 to vector<5x1xf32>
    %31 = arith.divf %29, %30 : vector<5x1xf32>
    %32 = vector.broadcast %31 : vector<5x1xf32> to vector<5x32xf32>
    %33 = arith.subf %3, %32 : vector<5x32xf32>
    %34 = arith.mulf %33, %33 : vector<5x32xf32>
    %cst_39 = arith.constant dense<0.000000e+00> : vector<5xf32>
    %35 = vector.multi_reduction <add>, %34, %cst_39 [1] : vector<5x32xf32> to vector<5xf32>
    %36 = vector.shape_cast %35 : vector<5xf32> to vector<5x1xf32>
    %cst_40 = arith.constant 3.200000e+01 : f32
    %37 = vector.broadcast %cst_40 : f32 to vector<5x1xf32>
    %38 = arith.divf %36, %37 : vector<5x1xf32>
    %cst_41 = arith.constant 9.99999974E-6 : f32
    %39 = vector.broadcast %cst_41 : f32 to vector<5x1xf32>
    %40 = arith.addf %38, %39 : vector<5x1xf32>
    %41 = math.rsqrt %40 : vector<5x1xf32>
    %42 = vector.broadcast %41 : vector<5x1xf32> to vector<5x32xf32>
    %43 = arith.mulf %33, %42 : vector<5x32xf32>
    %44 = vector.broadcast %5 : vector<1x32xf32> to vector<5x32xf32>
    %45 = arith.mulf %43, %44 : vector<5x32xf32>
    %46 = vector.broadcast %7 : vector<1x32xf32> to vector<5x32xf32>
    %47 = arith.addf %45, %46 : vector<5x32xf32>
    %48 = arith.truncf %47 : vector<5x32xf32> to vector<5x32xbf16>
    %cst_42 = arith.constant dense<0.000000e+00> : vector<5x96xf32>
    %49 = tpu.matmul %48, %9, %cst_42 {dimension_numbers = #tpu.dot_dimension_numbers<[1], [0], [0], [1], [0, 0, 1, 1], [], []>} : vector<5x32xbf16>, vector<32x96xbf16>, vector<5x96xf32> -> vector<5x96xf32>
    %50 = vector.broadcast %11 : vector<1x96xf32> to vector<5x96xf32>
    %51 = arith.addf %49, %50 : vector<5x96xf32>
    %52 = vector.extract_strided_slice %51 {offsets = [0, 0], sizes = [5, 16], strides = [1, 1]} : vector<5x96xf32> to vector<5x16xf32>
    %cst_43 = arith.constant 2.500000e-01 : f32
    %53 = vector.broadcast %cst_43 : f32 to vector<5x16xf32>
    %54 = arith.mulf %52, %53 : vector<5x16xf32>
    %55 = arith.truncf %54 : vector<5x16xf32> to vector<5x16xbf16>
    %56 = vector.extract_strided_slice %51 {offsets = [0, 32], sizes = [5, 16], strides = [1, 1]} : vector<5x96xf32> to vector<5x16xf32>
    %57 = arith.truncf %56 : vector<5x16xf32> to vector<5x16xbf16>
    %58 = vector.extract_strided_slice %51 {offsets = [0, 64], sizes = [5, 16], strides = [1, 1]} : vector<5x96xf32> to vector<5x16xf32>
    %59 = arith.truncf %58 : vector<5x16xf32> to vector<5x16xbf16>
    %cst_44 = arith.constant dense<0.000000e+00> : vector<5x5xf32>
    %60 = tpu.matmul %55, %57, %cst_44 {dimension_numbers = #tpu.dot_dimension_numbers<[1], [1], [0], [0], [0, 0, 1, 0], [], []>} : vector<5x16xbf16>, vector<5x16xbf16>, vector<5x5xf32> -> vector<5x5xf32>
    %cst_45 = arith.constant dense<0xFF800000> : vector<5xf32>
    %61 = vector.multi_reduction <maximumf>, %60, %cst_45 [1] : vector<5x5xf32> to vector<5xf32>
    %62 = vector.shape_cast %61 : vector<5xf32> to vector<5x1xf32>
    %63 = vector.broadcast %62 : vector<5x1xf32> to vector<5x5xf32>
    %64 = arith.subf %60, %63 : vector<5x5xf32>
    %65 = math.exp %64 : vector<5x5xf32>
    %cst_46 = arith.constant dense<0.000000e+00> : vector<5xf32>
    %66 = vector.multi_reduction <add>, %65, %cst_46 [1] : vector<5x5xf32> to vector<5xf32>
    %67 = vector.shape_cast %66 : vector<5xf32> to vector<5x1xf32>
    %68 = tpu.reciprocal %67 {approx = true} : vector<5x1xf32> -> vector<5x1xf32>
    %69 = arith.truncf %65 : vector<5x5xf32> to vector<5x5xbf16>
    %cst_47 = arith.constant dense<0.000000e+00> : vector<5x16xf32>
    %70 = tpu.matmul %69, %59, %cst_47 {dimension_numbers = #tpu.dot_dimension_numbers<[1], [0], [0], [1], [0, 0, 1, 1], [], []>} : vector<5x5xbf16>, vector<5x16xbf16>, vector<5x16xf32> -> vector<5x16xf32>
    %71 = vector.broadcast %68 : vector<5x1xf32> to vector<5x16xf32>
    %72 = arith.mulf %70, %71 : vector<5x16xf32>
    %73 = vector.extract_strided_slice %51 {offsets = [0, 16], sizes = [5, 16], strides = [1, 1]} : vector<5x96xf32> to vector<5x16xf32>
    %cst_48 = arith.constant 2.500000e-01 : f32
    %74 = vector.broadcast %cst_48 : f32 to vector<5x16xf32>
    %75 = arith.mulf %73, %74 : vector<5x16xf32>
    %76 = arith.truncf %75 : vector<5x16xf32> to vector<5x16xbf16>
    %77 = vector.extract_strided_slice %51 {offsets = [0, 48], sizes = [5, 16], strides = [1, 1]} : vector<5x96xf32> to vector<5x16xf32>
    %78 = arith.truncf %77 : vector<5x16xf32> to vector<5x16xbf16>
    %79 = vector.extract_strided_slice %51 {offsets = [0, 80], sizes = [5, 16], strides = [1, 1]} : vector<5x96xf32> to vector<5x16xf32>
    %80 = arith.truncf %79 : vector<5x16xf32> to vector<5x16xbf16>
    %cst_49 = arith.constant dense<0.000000e+00> : vector<5x5xf32>
    %81 = tpu.matmul %76, %78, %cst_49 {dimension_numbers = #tpu.dot_dimension_numbers<[1], [1], [0], [0], [0, 0, 1, 0], [], []>} : vector<5x16xbf16>, vector<5x16xbf16>, vector<5x5xf32> -> vector<5x5xf32>
    %cst_50 = arith.constant dense<0xFF800000> : vector<5xf32>
    %82 = vector.multi_reduction <maximumf>, %81, %cst_50 [1] : vector<5x5xf32> to vector<5xf32>
    %83 = vector.shape_cast %82 : vector<5xf32> to vector<5x1xf32>
    %84 = vector.broadcast %83 : vector<5x1xf32> to vector<5x5xf32>
    %85 = arith.subf %81, %84 : vector<5x5xf32>
    %86 = math.exp %85 : vector<5x5xf32>
    %cst_51 = arith.constant dense<0.000000e+00> : vector<5xf32>
    %87 = vector.multi_reduction <add>, %86, %cst_51 [1] : vector<5x5xf32> to vector<5xf32>
    %88 = vector.shape_cast %87 : vector<5xf32> to vector<5x1xf32>
    %89 = tpu.reciprocal %88 {approx = true} : vector<5x1xf32> -> vector<5x1xf32>
    %90 = arith.truncf %86 : vector<5x5xf32> to vector<5x5xbf16>
    %cst_52 = arith.constant dense<0.000000e+00> : vector<5x16xf32>
    %91 = tpu.matmul %90, %80, %cst_52 {dimension_numbers = #tpu.dot_dimension_numbers<[1], [0], [0], [1], [0, 0, 1, 1], [], []>} : vector<5x5xbf16>, vector<5x16xbf16>, vector<5x16xf32> -> vector<5x16xf32>
    %92 = vector.broadcast %89 : vector<5x1xf32> to vector<5x16xf32>
    %93 = arith.mulf %91, %92 : vector<5x16xf32>
    %94 = tpu.concatenate %72, %93 in 1 : vector<5x16xf32>, vector<5x16xf32> -> vector<5x32xf32>
    %95 = arith.truncf %94 : vector<5x32xf32> to vector<5x32xbf16>
    %cst_53 = arith.constant dense<0.000000e+00> : vector<5x32xf32>
    %96 = tpu.matmul %95, %13, %cst_53 {dimension_numbers = #tpu.dot_dimension_numbers<[1], [0], [0], [1], [0, 0, 1, 1], [], []>} : vector<5x32xbf16>, vector<32x32xbf16>, vector<5x32xf32> -> vector<5x32xf32>
    %97 = arith.addf %3, %96 : vector<5x32xf32>
    %98 = vector.broadcast %15 : vector<1x32xf32> to vector<5x32xf32>
    %99 = arith.addf %97, %98 : vector<5x32xf32>
    %cst_54 = arith.constant dense<0.000000e+00> : vector<5xf32>
    %100 = vector.multi_reduction <add>, %99, %cst_54 [1] : vector<5x32xf32> to vector<5xf32>
    %101 = vector.shape_cast %100 : vector<5xf32> to vector<5x1xf32>
    %cst_55 = arith.constant 3.200000e+01 : f32
    %102 = vector.broadcast %cst_55 : f32 to vector<5x1xf32>
    %103 = arith.divf %101, %102 : vector<5x1xf32>
    %104 = vector.broadcast %103 : vector<5x1xf32> to vector<5x32xf32>
    %105 = arith.subf %99, %104 : vector<5x32xf32>
    %106 = arith.mulf %105, %105 : vector<5x32xf32>
    %cst_56 = arith.constant dense<0.000000e+00> : vector<5xf32>
    %107 = vector.multi_reduction <add>, %106, %cst_56 [1] : vector<5x32xf32> to vector<5xf32>
    %108 = vector.shape_cast %107 : vector<5xf32> to vector<5x1xf32>
    %cst_57 = arith.constant 3.200000e+01 : f32
    %109 = vector.broadcast %cst_57 : f32 to vector<5x1xf32>
    %110 = arith.divf %108, %109 : vector<5x1xf32>
    %cst_58 = arith.constant 9.99999974E-6 : f32
    %111 = vector.broadcast %cst_58 : f32 to vector<5x1xf32>
    %112 = arith.addf %110, %111 : vector<5x1xf32>
    %113 = math.rsqrt %112 : vector<5x1xf32>
    %114 = vector.broadcast %113 : vector<5x1xf32> to vector<5x32xf32>
    %115 = arith.mulf %105, %114 : vector<5x32xf32>
    %116 = vector.broadcast %17 : vector<1x32xf32> to vector<5x32xf32>
    %117 = arith.mulf %115, %116 : vector<5x32xf32>
    %118 = vector.broadcast %19 : vector<1x32xf32> to vector<5x32xf32>
    %119 = arith.addf %117, %118 : vector<5x32xf32>
    %120 = arith.truncf %119 : vector<5x32xf32> to vector<5x32xbf16>
    %cst_59 = arith.constant dense<0.000000e+00> : vector<5x128xf32>
    %121 = tpu.matmul %120, %21, %cst_59 {dimension_numbers = #tpu.dot_dimension_numbers<[1], [0], [0], [1], [0, 0, 1, 1], [], []>} : vector<5x32xbf16>, vector<32x128xbf16>, vector<5x128xf32> -> vector<5x128xf32>
    %122 = vector.broadcast %23 : vector<1x128xf32> to vector<5x128xf32>
    %123 = arith.addf %121, %122 : vector<5x128xf32>
    %cst_60 = arith.constant 5.000000e-01 : f32
    %124 = vector.broadcast %cst_60 : f32 to vector<5x128xf32>
    %125 = arith.mulf %124, %123 : vector<5x128xf32>
    %cst_61 = arith.constant 0.707106769 : f32
    %126 = vector.broadcast %cst_61 : f32 to vector<5x128xf32>
    %127 = arith.mulf %123, %126 : vector<5x128xf32>
    %128 = math.absf %127 : vector<5x128xf32>
    %cst_62 = arith.constant 0.327591091 : f32
    %129 = vector.broadcast %cst_62 : f32 to vector<5x128xf32>
    %130 = arith.mulf %129, %128 : vector<5x128xf32>
    %cst_63 = arith.constant 1.000000e+00 : f32
    %131 = vector.broadcast %cst_63 : f32 to vector<5x128xf32>
    %132 = arith.addf %131, %130 : vector<5x128xf32>
    %cst_64 = arith.constant 1.000000e+00 : f32
    %133 = vector.broadcast %cst_64 : f32 to vector<5x128xf32>
    %134 = arith.divf %133, %132 : vector<5x128xf32>
    %cst_65 = arith.constant 1.06140542 : f32
    %135 = vector.broadcast %cst_65 : f32 to vector<5x128xf32>
    %136 = arith.mulf %135, %134 : vector<5x128xf32>
    %cst_66 = arith.constant -1.45315206 : f32
    %137 = vector.broadcast %cst_66 : f32 to vector<5x128xf32>
    %138 = arith.addf %136, %137 : vector<5x128xf32>
    %139 = arith.mulf %138, %134 : vector<5x128xf32>
    %cst_67 = arith.constant 1.42141378 : f32
    %140 = vector.broadcast %cst_67 : f32 to vector<5x128xf32>
    %141 = arith.addf %139, %140 : vector<5x128xf32>
    %142 = arith.mulf %141, %134 : vector<5x128xf32>
    %cst_68 = arith.constant -0.284496725 : f32
    %143 = vector.broadcast %cst_68 : f32 to vector<5x128xf32>
    %144 = arith.addf %142, %143 : vector<5x128xf32>
    %145 = arith.mulf %144, %134 : vector<5x128xf32>
    %cst_69 = arith.constant 0.254829586 : f32
    %146 = vector.broadcast %cst_69 : f32 to vector<5x128xf32>
    %147 = arith.addf %145, %146 : vector<5x128xf32>
    %148 = arith.mulf %147, %134 : vector<5x128xf32>
    %cst_70 = arith.constant 0.000000e+00 : f32
    %149 = vector.broadcast %cst_70 : f32 to vector<5x128xf32>
    %150 = arith.subf %149, %128 : vector<5x128xf32>
    %151 = arith.mulf %150, %128 : vector<5x128xf32>
    %152 = math.exp %151 : vector<5x128xf32>
    %153 = arith.mulf %148, %152 : vector<5x128xf32>
    %cst_71 = arith.constant 1.000000e+00 : f32
    %154 = vector.broadcast %cst_71 : f32 to vector<5x128xf32>
    %155 = arith.subf %154, %153 : vector<5x128xf32>
    %cst_72 = arith.constant 0.000000e+00 : f32
    %156 = vector.broadcast %cst_72 : f32 to vector<5x128xf32>
    %157 = arith.cmpf oge, %127, %156 : vector<5x128xf32>
    %cst_73 = arith.constant 0.000000e+00 : f32
    %158 = vector.broadcast %cst_73 : f32 to vector<5x128xf32>
    %159 = arith.subf %158, %155 : vector<5x128xf32>
    %160 = arith.select %157, %155, %159 : vector<5x128xi1>, vector<5x128xf32>
    %cst_74 = arith.constant 1.000000e+00 : f32
    %161 = vector.broadcast %cst_74 : f32 to vector<5x128xf32>
    %162 = arith.addf %161, %160 : vector<5x128xf32>
    %163 = arith.mulf %125, %162 : vector<5x128xf32>
    %164 = arith.truncf %163 : vector<5x128xf32> to vector<5x128xbf16>
    %cst_75 = arith.constant dense<0.000000e+00> : vector<5x32xf32>
    %165 = tpu.matmul %164, %25, %cst_75 {dimension_numbers = #tpu.dot_dimension_numbers<[1], [0], [0], [1], [0, 0, 1, 1], [], []>} : vector<5x128xbf16>, vector<128x32xbf16>, vector<5x32xf32> -> vector<5x32xf32>
    %166 = arith.addf %99, %165 : vector<5x32xf32>
    %167 = vector.broadcast %27 : vector<1x32xf32> to vector<5x32xf32>
    %168 = arith.addf %166, %167 : vector<5x32xf32>
    %c0_76 = arith.constant 0 : index
    %c0_77 = arith.constant 0 : index
    %169 = vector.load %arg23[%c0_76, %c0_77] : memref<5x32xf32, #tpu.memory_space<vmem>>, vector<5x32xf32>
    tpu.vector_store %arg23[%c0_76, %c0_77], %168 {strides = array<i32>} : memref<5x32xf32, #tpu.memory_space<vmem>>, vector<5x32xf32>,
    %c1_i32 = arith.constant 1 : i32
    %170 = arith.cmpi eq, %arg1, %c1_i32 : i32
    %171 = arith.extui %170 : i1 to i32
    %c0_i32_78 = arith.constant 0 : i32
    %172 = arith.cmpi ne, %171, %c0_i32_78 : i32
    scf.if %172 {
      %173 = vector.extract_strided_slice %168 {offsets = [0, 0], sizes = [1, 32], strides = [1, 1]} : vector<5x32xf32> to vector<1x32xf32>
      %c0_79 = arith.constant 0 : index
      %c0_80 = arith.constant 0 : index
      %174 = vector.load %arg19[%c0_79, %c0_80] : memref<1x32xf32, #tpu.memory_space<vmem>>, vector<1x32xf32>
      %c0_81 = arith.constant 0 : index
      %c0_82 = arith.constant 0 : index
      %175 = vector.load %arg20[%c0_81, %c0_82] : memref<1x32xf32, #tpu.memory_space<vmem>>, vector<1x32xf32>
      %c0_83 = arith.constant 0 : index
      %c0_84 = arith.constant 0 : index
      %176 = vector.load %arg21[%c0_83, %c0_84] : memref<32x32xbf16, #tpu.memory_space<vmem>>, vector<32x32xbf16>
      %cst_85 = arith.constant dense<0.000000e+00> : vector<1xf32>
      %177 = vector.multi_reduction <add>, %173, %cst_85 [1] : vector<1x32xf32> to vector<1xf32>
      %178 = vector.shape_cast %177 : vector<1xf32> to vector<1x1xf32>
      %cst_86 = arith.constant 3.200000e+01 : f32
      %179 = vector.broadcast %cst_86 : f32 to vector<1x1xf32>
      %180 = arith.divf %178, %179 : vector<1x1xf32>
      %181 = vector.broadcast %180 : vector<1x1xf32> to vector<1x32xf32>
      %182 = arith.subf %173, %181 : vector<1x32xf32>
      %183 = arith.mulf %182, %182 : vector<1x32xf32>
      %cst_87 = arith.constant dense<0.000000e+00> : vector<1xf32>
      %184 = vector.multi_reduction <add>, %183, %cst_87 [1] : vector<1x32xf32> to vector<1xf32>
      %185 = vector.shape_cast %184 : vector<1xf32> to vector<1x1xf32>
      %cst_88 = arith.constant 3.200000e+01 : f32
      %186 = vector.broadcast %cst_88 : f32 to vector<1x1xf32>
      %187 = arith.divf %185, %186 : vector<1x1xf32>
      %cst_89 = arith.constant 9.99999974E-6 : f32
      %188 = vector.broadcast %cst_89 : f32 to vector<1x1xf32>
      %189 = arith.addf %187, %188 : vector<1x1xf32>
      %190 = math.rsqrt %189 : vector<1x1xf32>
      %191 = vector.broadcast %190 : vector<1x1xf32> to vector<1x32xf32>
      %192 = arith.mulf %182, %191 : vector<1x32xf32>
      %193 = arith.mulf %192, %174 : vector<1x32xf32>
      %194 = arith.addf %193, %175 : vector<1x32xf32>
      %195 = arith.truncf %194 : vector<1x32xf32> to vector<1x32xbf16>
      %cst_90 = arith.constant dense<0.000000e+00> : vector<1x32xf32>
      %196 = tpu.matmul %195, %176, %cst_90 {dimension_numbers = #tpu.dot_dimension_numbers<[1], [0], [0], [1], [0, 0, 1, 1], [], []>} : vector<1x32xbf16>, vector<32x32xbf16>, vector<1x32xf32> -> vector<1x32xf32>
      %197 = arith.mulf %196, %196 : vector<1x32xf32>
      %cst_91 = arith.constant dense<0.000000e+00> : vector<1xf32>
      %198 = vector.multi_reduction <add>, %197, %cst_91 [1] : vector<1x32xf32> to vector<1xf32>
      %199 = vector.shape_cast %198 : vector<1xf32> to vector<1x1xf32>
      %cst_92 = arith.constant 9.99999996E-13 : f32
      %200 = vector.broadcast %cst_92 : f32 to vector<1x1xf32>
      %201 = arith.addf %199, %200 : vector<1x1xf32>
      %202 = math.rsqrt %201 : vector<1x1xf32>
      %203 = vector.broadcast %202 : vector<1x1xf32> to vector<1x32xf32>
      %204 = arith.mulf %196, %203 : vector<1x32xf32>
      %c0_93 = arith.constant 0 : index
      %c0_94 = arith.constant 0 : index
      %c0_95 = arith.constant 0 : index
      %205 = vector.load %arg22[%c0_93, %c0_94, %c0_95] : memref<1x1x32xf32, #tpu.memory_space<vmem>>, vector<1x1x32xf32>
      %206 = vector.shape_cast %205 : vector<1x1x32xf32> to vector<1x32xf32>
      %207 = vector.shape_cast %204 : vector<1x32xf32> to vector<1x1x32xf32>
      tpu.vector_store %arg22[%c0_93, %c0_94, %c0_95], %207 {strides = array<i32>} : memref<1x1x32xf32, #tpu.memory_space<vmem>>, vector<1x1x32xf32>,
    } else {
    }
    return
  }
  func.func @transform_0(%arg0: i32, %arg1: i32) -> (i32, i32, i32) {
    %c0_i32 = arith.constant 0 : i32
    %c0_i32_0 = arith.constant 0 : i32
    %c0_i32_1 = arith.constant 0 : i32
    return %arg0, %c0_i32, %c0_i32_0 : i32, i32, i32
  }
  func.func @transform_1(%arg0: i32, %arg1: i32) -> (i32, i32) {
    %c0_i32 = arith.constant 0 : i32
    %c0_i32_0 = arith.constant 0 : i32
    %c0_i32_1 = arith.constant 0 : i32
    return %c0_i32, %c0_i32_0 : i32, i32
  }
  func.func @transform_2(%arg0: i32, %arg1: i32) -> (i32, i32) {
    %c0_i32 = arith.constant 0 : i32
    %c0_i32_0 = arith.constant 0 : i32
    %c0_i32_1 = arith.constant 0 : i32
    return %c0_i32, %c0_i32_0 : i32, i32
  }
  func.func @transform_3(%arg0: i32, %arg1: i32) -> (i32, i32) {
    %c0_i32 = arith.constant 0 : i32
    %c0_i32_0 = arith.constant 0 : i32
    %c0_i32_1 = arith.constant 0 : i32
    return %c0_i32, %c0_i32_0 : i32, i32
  }
  func.func @transform_4(%arg0: i32, %arg1: i32) -> (i32, i32) {
    %c0_i32 = arith.constant 0 : i32
    %c0_i32_0 = arith.constant 0 : i32
    %c0_i32_1 = arith.constant 0 : i32
    return %c0_i32, %c0_i32_0 : i32, i32
  }
  func.func @transform_5(%arg0: i32, %arg1: i32) -> (i32, i32, i32) {
    %c0_i32 = arith.constant 0 : i32
    %c0_i32_0 = arith.constant 0 : i32
    %c0_i32_1 = arith.constant 0 : i32
    return %arg1, %c0_i32, %c0_i32_0 : i32, i32, i32
  }
  func.func @transform_6(%arg0: i32, %arg1: i32) -> (i32, i32, i32) {
    %c0_i32 = arith.constant 0 : i32
    %c0_i32_0 = arith.constant 0 : i32
    %c0_i32_1 = arith.constant 0 : i32
    return %arg1, %c0_i32, %c0_i32_0 : i32, i32, i32
  }
  func.func @transform_7(%arg0: i32, %arg1: i32) -> (i32, i32, i32) {
    %c0_i32 = arith.constant 0 : i32
    %c0_i32_0 = arith.constant 0 : i32
    %c0_i32_1 = arith.constant 0 : i32
    return %arg1, %c0_i32, %c0_i32_0 : i32, i32, i32
  }
  func.func @transform_8(%arg0: i32, %arg1: i32) -> (i32, i32, i32) {
    %c0_i32 = arith.constant 0 : i32
    %c0_i32_0 = arith.constant 0 : i32
    %c0_i32_1 = arith.constant 0 : i32
    return %arg1, %c0_i32, %c0_i32_0 : i32, i32, i32
  }
  func.func @transform_9(%arg0: i32, %arg1: i32) -> (i32, i32, i32) {
    %c0_i32 = arith.constant 0 : i32
    %c0_i32_0 = arith.constant 0 : i32
    %c0_i32_1 = arith.constant 0 : i32
    return %arg1, %c0_i32, %c0_i32_0 : i32, i32, i32
  }
  func.func @transform_10(%arg0: i32, %arg1: i32) -> (i32, i32, i32) {
    %c0_i32 = arith.constant 0 : i32
    %c0_i32_0 = arith.constant 0 : i32
    %c0_i32_1 = arith.constant 0 : i32
    return %arg1, %c0_i32, %c0_i32_0 : i32, i32, i32
  }
  func.func @transform_11(%arg0: i32, %arg1: i32) -> (i32, i32, i32) {
    %c0_i32 = arith.constant 0 : i32
    %c0_i32_0 = arith.constant 0 : i32
    %c0_i32_1 = arith.constant 0 : i32
    return %arg1, %c0_i32, %c0_i32_0 : i32, i32, i32
  }
  func.func @transform_12(%arg0: i32, %arg1: i32) -> (i32, i32, i32) {
    %c0_i32 = arith.constant 0 : i32
    %c0_i32_0 = arith.constant 0 : i32
    %c0_i32_1 = arith.constant 0 : i32
    return %arg1, %c0_i32, %c0_i32_0 : i32, i32, i32
  }
  func.func @transform_13(%arg0: i32, %arg1: i32) -> (i32, i32, i32) {
    %c0_i32 = arith.constant 0 : i32
    %c0_i32_0 = arith.constant 0 : i32
    %c0_i32_1 = arith.constant 0 : i32
    return %arg1, %c0_i32, %c0_i32_0 : i32, i32, i32
  }
  func.func @transform_14(%arg0: i32, %arg1: i32) -> (i32, i32, i32) {
    %c0_i32 = arith.constant 0 : i32
    %c0_i32_0 = arith.constant 0 : i32
    %c0_i32_1 = arith.constant 0 : i32
    return %arg1, %c0_i32, %c0_i32_0 : i32, i32, i32
  }
  func.func @transform_15(%arg0: i32, %arg1: i32) -> (i32, i32, i32) {
    %c0_i32 = arith.constant 0 : i32
    %c0_i32_0 = arith.constant 0 : i32
    %c0_i32_1 = arith.constant 0 : i32
    return %arg1, %c0_i32, %c0_i32_0 : i32, i32, i32
  }
  func.func @transform_16(%arg0: i32, %arg1: i32) -> (i32, i32, i32) {
    %c0_i32 = arith.constant 0 : i32
    %c0_i32_0 = arith.constant 0 : i32
    %c0_i32_1 = arith.constant 0 : i32
    return %arg1, %c0_i32, %c0_i32_0 : i32, i32, i32
  }
  func.func @transform_17(%arg0: i32, %arg1: i32) -> (i32, i32) {
    %c0_i32 = arith.constant 0 : i32
    %c0_i32_0 = arith.constant 0 : i32
    %c0_i32_1 = arith.constant 0 : i32
    return %c0_i32, %c0_i32_0 : i32, i32
  }
  func.func @transform_18(%arg0: i32, %arg1: i32) -> (i32, i32) {
    %c0_i32 = arith.constant 0 : i32
    %c0_i32_0 = arith.constant 0 : i32
    %c0_i32_1 = arith.constant 0 : i32
    return %c0_i32, %c0_i32_0 : i32, i32
  }
  func.func @transform_19(%arg0: i32, %arg1: i32) -> (i32, i32) {
    %c0_i32 = arith.constant 0 : i32
    %c0_i32_0 = arith.constant 0 : i32
    %c0_i32_1 = arith.constant 0 : i32
    return %c0_i32, %c0_i32_0 : i32, i32
  }
  func.func @transform_20(%arg0: i32, %arg1: i32) -> (i32, i32, i32) {
    %c0_i32 = arith.constant 0 : i32
    %c0_i32_0 = arith.constant 0 : i32
    %c0_i32_1 = arith.constant 0 : i32
    return %arg0, %c0_i32, %c0_i32_0 : i32, i32, i32
  }
}

module attributes {stable_mosaic.version = 11 : i64} {
  func.func @_text_kernel(%arg0: i32, %arg1: i32, %arg2: memref<2xi32, #tpu.memory_space<smem>>, %arg3: memref<1x8x32xf32, #tpu.memory_space<vmem>>, %arg4: memref<1x1x32xf32, #tpu.memory_space<vmem>>, %arg5: memref<1x1x32xf32, #tpu.memory_space<vmem>>, %arg6: memref<1x32x96xbf16, #tpu.memory_space<vmem>>, %arg7: memref<1x1x96xf32, #tpu.memory_space<vmem>>, %arg8: memref<1x32x32xbf16, #tpu.memory_space<vmem>>, %arg9: memref<1x1x32xf32, #tpu.memory_space<vmem>>, %arg10: memref<1x1x32xf32, #tpu.memory_space<vmem>>, %arg11: memref<1x1x32xf32, #tpu.memory_space<vmem>>, %arg12: memref<1x32x128xbf16, #tpu.memory_space<vmem>>, %arg13: memref<1x1x128xf32, #tpu.memory_space<vmem>>, %arg14: memref<1x128x32xbf16, #tpu.memory_space<vmem>>, %arg15: memref<1x1x32xf32, #tpu.memory_space<vmem>>, %arg16: memref<1x32xf32, #tpu.memory_space<vmem>>, %arg17: memref<1x32xf32, #tpu.memory_space<vmem>>, %arg18: memref<32x32xbf16, #tpu.memory_space<vmem>>, %arg19: memref<1x1x32xf32, #tpu.memory_space<vmem>>, %arg20: memref<8x32xf32, #tpu.memory_space<vmem>>) attributes {dimension_semantics = [#tpu.dimension_semantics<parallel>, #tpu.dimension_semantics<arbitrary>], iteration_bounds = array<i64: 2, 2>, scalar_prefetch = 1 : i64, scratch_operands = 1 : i64, tpu.core_type = #tpu.core_type<tc>, window_params = [{transform_indices = @transform_0, window_bounds = array<i64: 1, 8, 32>}, {transform_indices = @transform_1, window_bounds = array<i64: 1, 1, 32>}, {transform_indices = @transform_2, window_bounds = array<i64: 1, 1, 32>}, {transform_indices = @transform_3, window_bounds = array<i64: 1, 32, 96>}, {transform_indices = @transform_4, window_bounds = array<i64: 1, 1, 96>}, {transform_indices = @transform_5, window_bounds = array<i64: 1, 32, 32>}, {transform_indices = @transform_6, window_bounds = array<i64: 1, 1, 32>}, {transform_indices = @transform_7, window_bounds = array<i64: 1, 1, 32>}, {transform_indices = @transform_8, window_bounds = array<i64: 1, 1, 32>}, {transform_indices = @transform_9, window_bounds = array<i64: 1, 32, 128>}, {transform_indices = @transform_10, window_bounds = array<i64: 1, 1, 128>}, {transform_indices = @transform_11, window_bounds = array<i64: 1, 128, 32>}, {transform_indices = @transform_12, window_bounds = array<i64: 1, 1, 32>}, {pipeline_mode = #tpu.pipeline_mode<synchronous>, transform_indices = @transform_13, window_bounds = array<i64: 1, 32>}, {pipeline_mode = #tpu.pipeline_mode<synchronous>, transform_indices = @transform_14, window_bounds = array<i64: 1, 32>}, {pipeline_mode = #tpu.pipeline_mode<synchronous>, transform_indices = @transform_15, window_bounds = array<i64: 32, 32>}, {transform_indices = @transform_16, window_bounds = array<i64: 1, 1, 32>}]} {
    %c0_i32 = arith.constant 0 : i32
    %0 = arith.cmpi eq, %arg1, %c0_i32 : i32
    %1 = arith.extui %0 : i1 to i32
    %c0_i32_0 = arith.constant 0 : i32
    %2 = arith.cmpi ne, %1, %c0_i32_0 : i32
    scf.if %2 {
      %c0_81 = arith.constant 0 : index
      %c0_82 = arith.constant 0 : index
      %c0_83 = arith.constant 0 : index
      %181 = vector.load %arg3[%c0_81, %c0_82, %c0_83] : memref<1x8x32xf32, #tpu.memory_space<vmem>>, vector<1x8x32xf32>
      %182 = vector.shape_cast %181 : vector<1x8x32xf32> to vector<8x32xf32>
      %c0_84 = arith.constant 0 : index
      %c0_85 = arith.constant 0 : index
      %183 = vector.load %arg20[%c0_84, %c0_85] : memref<8x32xf32, #tpu.memory_space<vmem>>, vector<8x32xf32>
      tpu.vector_store %arg20[%c0_84, %c0_85], %182 {strides = array<i32>} : memref<8x32xf32, #tpu.memory_space<vmem>>, vector<8x32xf32>,
    } else {
    }
    %c0 = arith.constant 0 : index
    %c0_1 = arith.constant 0 : index
    %3 = vector.load %arg20[%c0, %c0_1] : memref<8x32xf32, #tpu.memory_space<vmem>>, vector<8x32xf32>
    %c0_2 = arith.constant 0 : index
    %c0_3 = arith.constant 0 : index
    %c0_4 = arith.constant 0 : index
    %4 = vector.load %arg4[%c0_2, %c0_3, %c0_4] : memref<1x1x32xf32, #tpu.memory_space<vmem>>, vector<1x1x32xf32>
    %5 = vector.shape_cast %4 : vector<1x1x32xf32> to vector<1x32xf32>
    %c0_5 = arith.constant 0 : index
    %c0_6 = arith.constant 0 : index
    %c0_7 = arith.constant 0 : index
    %6 = vector.load %arg5[%c0_5, %c0_6, %c0_7] : memref<1x1x32xf32, #tpu.memory_space<vmem>>, vector<1x1x32xf32>
    %7 = vector.shape_cast %6 : vector<1x1x32xf32> to vector<1x32xf32>
    %c0_8 = arith.constant 0 : index
    %c0_9 = arith.constant 0 : index
    %c0_10 = arith.constant 0 : index
    %8 = vector.load %arg6[%c0_8, %c0_9, %c0_10] : memref<1x32x96xbf16, #tpu.memory_space<vmem>>, vector<1x32x96xbf16>
    %9 = vector.shape_cast %8 : vector<1x32x96xbf16> to vector<32x96xbf16>
    %c0_11 = arith.constant 0 : index
    %c0_12 = arith.constant 0 : index
    %c0_13 = arith.constant 0 : index
    %10 = vector.load %arg7[%c0_11, %c0_12, %c0_13] : memref<1x1x96xf32, #tpu.memory_space<vmem>>, vector<1x1x96xf32>
    %11 = vector.shape_cast %10 : vector<1x1x96xf32> to vector<1x96xf32>
    %c0_14 = arith.constant 0 : index
    %c0_15 = arith.constant 0 : index
    %c0_16 = arith.constant 0 : index
    %12 = vector.load %arg8[%c0_14, %c0_15, %c0_16] : memref<1x32x32xbf16, #tpu.memory_space<vmem>>, vector<1x32x32xbf16>
    %13 = vector.shape_cast %12 : vector<1x32x32xbf16> to vector<32x32xbf16>
    %c0_17 = arith.constant 0 : index
    %c0_18 = arith.constant 0 : index
    %c0_19 = arith.constant 0 : index
    %14 = vector.load %arg9[%c0_17, %c0_18, %c0_19] : memref<1x1x32xf32, #tpu.memory_space<vmem>>, vector<1x1x32xf32>
    %15 = vector.shape_cast %14 : vector<1x1x32xf32> to vector<1x32xf32>
    %c0_20 = arith.constant 0 : index
    %c0_21 = arith.constant 0 : index
    %c0_22 = arith.constant 0 : index
    %16 = vector.load %arg10[%c0_20, %c0_21, %c0_22] : memref<1x1x32xf32, #tpu.memory_space<vmem>>, vector<1x1x32xf32>
    %17 = vector.shape_cast %16 : vector<1x1x32xf32> to vector<1x32xf32>
    %c0_23 = arith.constant 0 : index
    %c0_24 = arith.constant 0 : index
    %c0_25 = arith.constant 0 : index
    %18 = vector.load %arg11[%c0_23, %c0_24, %c0_25] : memref<1x1x32xf32, #tpu.memory_space<vmem>>, vector<1x1x32xf32>
    %19 = vector.shape_cast %18 : vector<1x1x32xf32> to vector<1x32xf32>
    %c0_26 = arith.constant 0 : index
    %c0_27 = arith.constant 0 : index
    %c0_28 = arith.constant 0 : index
    %20 = vector.load %arg12[%c0_26, %c0_27, %c0_28] : memref<1x32x128xbf16, #tpu.memory_space<vmem>>, vector<1x32x128xbf16>
    %21 = vector.shape_cast %20 : vector<1x32x128xbf16> to vector<32x128xbf16>
    %c0_29 = arith.constant 0 : index
    %c0_30 = arith.constant 0 : index
    %c0_31 = arith.constant 0 : index
    %22 = vector.load %arg13[%c0_29, %c0_30, %c0_31] : memref<1x1x128xf32, #tpu.memory_space<vmem>>, vector<1x1x128xf32>
    %23 = vector.shape_cast %22 : vector<1x1x128xf32> to vector<1x128xf32>
    %c0_32 = arith.constant 0 : index
    %c0_33 = arith.constant 0 : index
    %c0_34 = arith.constant 0 : index
    %24 = vector.load %arg14[%c0_32, %c0_33, %c0_34] : memref<1x128x32xbf16, #tpu.memory_space<vmem>>, vector<1x128x32xbf16>
    %25 = vector.shape_cast %24 : vector<1x128x32xbf16> to vector<128x32xbf16>
    %c0_35 = arith.constant 0 : index
    %c0_36 = arith.constant 0 : index
    %c0_37 = arith.constant 0 : index
    %26 = vector.load %arg15[%c0_35, %c0_36, %c0_37] : memref<1x1x32xf32, #tpu.memory_space<vmem>>, vector<1x1x32xf32>
    %27 = vector.shape_cast %26 : vector<1x1x32xf32> to vector<1x32xf32>
    %cst = arith.constant dense<0.000000e+00> : vector<8xf32>
    %28 = vector.multi_reduction <add>, %3, %cst [1] : vector<8x32xf32> to vector<8xf32>
    %29 = vector.shape_cast %28 : vector<8xf32> to vector<8x1xf32>
    %cst_38 = arith.constant 3.200000e+01 : f32
    %30 = vector.broadcast %cst_38 : f32 to vector<8x1xf32>
    %31 = arith.divf %29, %30 : vector<8x1xf32>
    %32 = vector.broadcast %31 : vector<8x1xf32> to vector<8x32xf32>
    %33 = arith.subf %3, %32 : vector<8x32xf32>
    %34 = arith.mulf %33, %33 : vector<8x32xf32>
    %cst_39 = arith.constant dense<0.000000e+00> : vector<8xf32>
    %35 = vector.multi_reduction <add>, %34, %cst_39 [1] : vector<8x32xf32> to vector<8xf32>
    %36 = vector.shape_cast %35 : vector<8xf32> to vector<8x1xf32>
    %cst_40 = arith.constant 3.200000e+01 : f32
    %37 = vector.broadcast %cst_40 : f32 to vector<8x1xf32>
    %38 = arith.divf %36, %37 : vector<8x1xf32>
    %cst_41 = arith.constant 9.99999974E-6 : f32
    %39 = vector.broadcast %cst_41 : f32 to vector<8x1xf32>
    %40 = arith.addf %38, %39 : vector<8x1xf32>
    %41 = math.rsqrt %40 : vector<8x1xf32>
    %42 = vector.broadcast %41 : vector<8x1xf32> to vector<8x32xf32>
    %43 = arith.mulf %33, %42 : vector<8x32xf32>
    %44 = vector.broadcast %5 : vector<1x32xf32> to vector<8x32xf32>
    %45 = arith.mulf %43, %44 : vector<8x32xf32>
    %46 = vector.broadcast %7 : vector<1x32xf32> to vector<8x32xf32>
    %47 = arith.addf %45, %46 : vector<8x32xf32>
    %48 = arith.truncf %47 : vector<8x32xf32> to vector<8x32xbf16>
    %cst_42 = arith.constant dense<0.000000e+00> : vector<8x96xf32>
    %49 = tpu.matmul %48, %9, %cst_42 {dimension_numbers = #tpu.dot_dimension_numbers<[1], [0], [0], [1], [0, 0, 1, 1], [], []>} : vector<8x32xbf16>, vector<32x96xbf16>, vector<8x96xf32> -> vector<8x96xf32>
    %50 = vector.broadcast %11 : vector<1x96xf32> to vector<8x96xf32>
    %51 = arith.addf %49, %50 : vector<8x96xf32>
    %52 = tpu.iota {dimensions = array<i32: 0>} : vector<8x8xi32>
    %53 = tpu.iota {dimensions = array<i32: 1>} : vector<8x8xi32>
    %54 = arith.cmpi sle, %53, %52 : vector<8x8xi32>
    %cst_43 = arith.constant 0.000000e+00 : f32
    %cst_44 = arith.constant -1.000000e+30 : f32
    %55 = vector.broadcast %cst_43 : f32 to vector<8x8xf32>
    %56 = vector.broadcast %cst_44 : f32 to vector<8x8xf32>
    %57 = arith.select %54, %55, %56 : vector<8x8xi1>, vector<8x8xf32>
    %58 = vector.extract_strided_slice %51 {offsets = [0, 0], sizes = [8, 16], strides = [1, 1]} : vector<8x96xf32> to vector<8x16xf32>
    %cst_45 = arith.constant 2.500000e-01 : f32
    %59 = vector.broadcast %cst_45 : f32 to vector<8x16xf32>
    %60 = arith.mulf %58, %59 : vector<8x16xf32>
    %61 = arith.truncf %60 : vector<8x16xf32> to vector<8x16xbf16>
    %62 = vector.extract_strided_slice %51 {offsets = [0, 32], sizes = [8, 16], strides = [1, 1]} : vector<8x96xf32> to vector<8x16xf32>
    %63 = arith.truncf %62 : vector<8x16xf32> to vector<8x16xbf16>
    %64 = vector.extract_strided_slice %51 {offsets = [0, 64], sizes = [8, 16], strides = [1, 1]} : vector<8x96xf32> to vector<8x16xf32>
    %65 = arith.truncf %64 : vector<8x16xf32> to vector<8x16xbf16>
    %cst_46 = arith.constant dense<0.000000e+00> : vector<8x8xf32>
    %66 = tpu.matmul %61, %63, %cst_46 {dimension_numbers = #tpu.dot_dimension_numbers<[1], [1], [0], [0], [0, 0, 1, 0], [], []>} : vector<8x16xbf16>, vector<8x16xbf16>, vector<8x8xf32> -> vector<8x8xf32>
    %67 = arith.addf %66, %57 : vector<8x8xf32>
    %cst_47 = arith.constant dense<0xFF800000> : vector<8xf32>
    %68 = vector.multi_reduction <maximumf>, %67, %cst_47 [1] : vector<8x8xf32> to vector<8xf32>
    %69 = vector.shape_cast %68 : vector<8xf32> to vector<8x1xf32>
    %70 = vector.broadcast %69 : vector<8x1xf32> to vector<8x8xf32>
    %71 = arith.subf %67, %70 : vector<8x8xf32>
    %72 = math.exp %71 : vector<8x8xf32>
    %cst_48 = arith.constant dense<0.000000e+00> : vector<8xf32>
    %73 = vector.multi_reduction <add>, %72, %cst_48 [1] : vector<8x8xf32> to vector<8xf32>
    %74 = vector.shape_cast %73 : vector<8xf32> to vector<8x1xf32>
    %75 = tpu.reciprocal %74 {approx = true} : vector<8x1xf32> -> vector<8x1xf32>
    %76 = arith.truncf %72 : vector<8x8xf32> to vector<8x8xbf16>
    %cst_49 = arith.constant dense<0.000000e+00> : vector<8x16xf32>
    %77 = tpu.matmul %76, %65, %cst_49 {dimension_numbers = #tpu.dot_dimension_numbers<[1], [0], [0], [1], [0, 0, 1, 1], [], []>} : vector<8x8xbf16>, vector<8x16xbf16>, vector<8x16xf32> -> vector<8x16xf32>
    %78 = vector.broadcast %75 : vector<8x1xf32> to vector<8x16xf32>
    %79 = arith.mulf %77, %78 : vector<8x16xf32>
    %80 = vector.extract_strided_slice %51 {offsets = [0, 16], sizes = [8, 16], strides = [1, 1]} : vector<8x96xf32> to vector<8x16xf32>
    %cst_50 = arith.constant 2.500000e-01 : f32
    %81 = vector.broadcast %cst_50 : f32 to vector<8x16xf32>
    %82 = arith.mulf %80, %81 : vector<8x16xf32>
    %83 = arith.truncf %82 : vector<8x16xf32> to vector<8x16xbf16>
    %84 = vector.extract_strided_slice %51 {offsets = [0, 48], sizes = [8, 16], strides = [1, 1]} : vector<8x96xf32> to vector<8x16xf32>
    %85 = arith.truncf %84 : vector<8x16xf32> to vector<8x16xbf16>
    %86 = vector.extract_strided_slice %51 {offsets = [0, 80], sizes = [8, 16], strides = [1, 1]} : vector<8x96xf32> to vector<8x16xf32>
    %87 = arith.truncf %86 : vector<8x16xf32> to vector<8x16xbf16>
    %cst_51 = arith.constant dense<0.000000e+00> : vector<8x8xf32>
    %88 = tpu.matmul %83, %85, %cst_51 {dimension_numbers = #tpu.dot_dimension_numbers<[1], [1], [0], [0], [0, 0, 1, 0], [], []>} : vector<8x16xbf16>, vector<8x16xbf16>, vector<8x8xf32> -> vector<8x8xf32>
    %89 = arith.addf %88, %57 : vector<8x8xf32>
    %cst_52 = arith.constant dense<0xFF800000> : vector<8xf32>
    %90 = vector.multi_reduction <maximumf>, %89, %cst_52 [1] : vector<8x8xf32> to vector<8xf32>
    %91 = vector.shape_cast %90 : vector<8xf32> to vector<8x1xf32>
    %92 = vector.broadcast %91 : vector<8x1xf32> to vector<8x8xf32>
    %93 = arith.subf %89, %92 : vector<8x8xf32>
    %94 = math.exp %93 : vector<8x8xf32>
    %cst_53 = arith.constant dense<0.000000e+00> : vector<8xf32>
    %95 = vector.multi_reduction <add>, %94, %cst_53 [1] : vector<8x8xf32> to vector<8xf32>
    %96 = vector.shape_cast %95 : vector<8xf32> to vector<8x1xf32>
    %97 = tpu.reciprocal %96 {approx = true} : vector<8x1xf32> -> vector<8x1xf32>
    %98 = arith.truncf %94 : vector<8x8xf32> to vector<8x8xbf16>
    %cst_54 = arith.constant dense<0.000000e+00> : vector<8x16xf32>
    %99 = tpu.matmul %98, %87, %cst_54 {dimension_numbers = #tpu.dot_dimension_numbers<[1], [0], [0], [1], [0, 0, 1, 1], [], []>} : vector<8x8xbf16>, vector<8x16xbf16>, vector<8x16xf32> -> vector<8x16xf32>
    %100 = vector.broadcast %97 : vector<8x1xf32> to vector<8x16xf32>
    %101 = arith.mulf %99, %100 : vector<8x16xf32>
    %102 = tpu.concatenate %79, %101 in 1 : vector<8x16xf32>, vector<8x16xf32> -> vector<8x32xf32>
    %103 = arith.truncf %102 : vector<8x32xf32> to vector<8x32xbf16>
    %cst_55 = arith.constant dense<0.000000e+00> : vector<8x32xf32>
    %104 = tpu.matmul %103, %13, %cst_55 {dimension_numbers = #tpu.dot_dimension_numbers<[1], [0], [0], [1], [0, 0, 1, 1], [], []>} : vector<8x32xbf16>, vector<32x32xbf16>, vector<8x32xf32> -> vector<8x32xf32>
    %105 = arith.addf %3, %104 : vector<8x32xf32>
    %106 = vector.broadcast %15 : vector<1x32xf32> to vector<8x32xf32>
    %107 = arith.addf %105, %106 : vector<8x32xf32>
    %cst_56 = arith.constant dense<0.000000e+00> : vector<8xf32>
    %108 = vector.multi_reduction <add>, %107, %cst_56 [1] : vector<8x32xf32> to vector<8xf32>
    %109 = vector.shape_cast %108 : vector<8xf32> to vector<8x1xf32>
    %cst_57 = arith.constant 3.200000e+01 : f32
    %110 = vector.broadcast %cst_57 : f32 to vector<8x1xf32>
    %111 = arith.divf %109, %110 : vector<8x1xf32>
    %112 = vector.broadcast %111 : vector<8x1xf32> to vector<8x32xf32>
    %113 = arith.subf %107, %112 : vector<8x32xf32>
    %114 = arith.mulf %113, %113 : vector<8x32xf32>
    %cst_58 = arith.constant dense<0.000000e+00> : vector<8xf32>
    %115 = vector.multi_reduction <add>, %114, %cst_58 [1] : vector<8x32xf32> to vector<8xf32>
    %116 = vector.shape_cast %115 : vector<8xf32> to vector<8x1xf32>
    %cst_59 = arith.constant 3.200000e+01 : f32
    %117 = vector.broadcast %cst_59 : f32 to vector<8x1xf32>
    %118 = arith.divf %116, %117 : vector<8x1xf32>
    %cst_60 = arith.constant 9.99999974E-6 : f32
    %119 = vector.broadcast %cst_60 : f32 to vector<8x1xf32>
    %120 = arith.addf %118, %119 : vector<8x1xf32>
    %121 = math.rsqrt %120 : vector<8x1xf32>
    %122 = vector.broadcast %121 : vector<8x1xf32> to vector<8x32xf32>
    %123 = arith.mulf %113, %122 : vector<8x32xf32>
    %124 = vector.broadcast %17 : vector<1x32xf32> to vector<8x32xf32>
    %125 = arith.mulf %123, %124 : vector<8x32xf32>
    %126 = vector.broadcast %19 : vector<1x32xf32> to vector<8x32xf32>
    %127 = arith.addf %125, %126 : vector<8x32xf32>
    %128 = arith.truncf %127 : vector<8x32xf32> to vector<8x32xbf16>
    %cst_61 = arith.constant dense<0.000000e+00> : vector<8x128xf32>
    %129 = tpu.matmul %128, %21, %cst_61 {dimension_numbers = #tpu.dot_dimension_numbers<[1], [0], [0], [1], [0, 0, 1, 1], [], []>} : vector<8x32xbf16>, vector<32x128xbf16>, vector<8x128xf32> -> vector<8x128xf32>
    %130 = vector.broadcast %23 : vector<1x128xf32> to vector<8x128xf32>
    %131 = arith.addf %129, %130 : vector<8x128xf32>
    %cst_62 = arith.constant 5.000000e-01 : f32
    %132 = vector.broadcast %cst_62 : f32 to vector<8x128xf32>
    %133 = arith.mulf %132, %131 : vector<8x128xf32>
    %cst_63 = arith.constant 0.707106769 : f32
    %134 = vector.broadcast %cst_63 : f32 to vector<8x128xf32>
    %135 = arith.mulf %131, %134 : vector<8x128xf32>
    %136 = math.absf %135 : vector<8x128xf32>
    %cst_64 = arith.constant 0.327591091 : f32
    %137 = vector.broadcast %cst_64 : f32 to vector<8x128xf32>
    %138 = arith.mulf %137, %136 : vector<8x128xf32>
    %cst_65 = arith.constant 1.000000e+00 : f32
    %139 = vector.broadcast %cst_65 : f32 to vector<8x128xf32>
    %140 = arith.addf %139, %138 : vector<8x128xf32>
    %cst_66 = arith.constant 1.000000e+00 : f32
    %141 = vector.broadcast %cst_66 : f32 to vector<8x128xf32>
    %142 = arith.divf %141, %140 : vector<8x128xf32>
    %cst_67 = arith.constant 1.06140542 : f32
    %143 = vector.broadcast %cst_67 : f32 to vector<8x128xf32>
    %144 = arith.mulf %143, %142 : vector<8x128xf32>
    %cst_68 = arith.constant -1.45315206 : f32
    %145 = vector.broadcast %cst_68 : f32 to vector<8x128xf32>
    %146 = arith.addf %144, %145 : vector<8x128xf32>
    %147 = arith.mulf %146, %142 : vector<8x128xf32>
    %cst_69 = arith.constant 1.42141378 : f32
    %148 = vector.broadcast %cst_69 : f32 to vector<8x128xf32>
    %149 = arith.addf %147, %148 : vector<8x128xf32>
    %150 = arith.mulf %149, %142 : vector<8x128xf32>
    %cst_70 = arith.constant -0.284496725 : f32
    %151 = vector.broadcast %cst_70 : f32 to vector<8x128xf32>
    %152 = arith.addf %150, %151 : vector<8x128xf32>
    %153 = arith.mulf %152, %142 : vector<8x128xf32>
    %cst_71 = arith.constant 0.254829586 : f32
    %154 = vector.broadcast %cst_71 : f32 to vector<8x128xf32>
    %155 = arith.addf %153, %154 : vector<8x128xf32>
    %156 = arith.mulf %155, %142 : vector<8x128xf32>
    %cst_72 = arith.constant 0.000000e+00 : f32
    %157 = vector.broadcast %cst_72 : f32 to vector<8x128xf32>
    %158 = arith.subf %157, %136 : vector<8x128xf32>
    %159 = arith.mulf %158, %136 : vector<8x128xf32>
    %160 = math.exp %159 : vector<8x128xf32>
    %161 = arith.mulf %156, %160 : vector<8x128xf32>
    %cst_73 = arith.constant 1.000000e+00 : f32
    %162 = vector.broadcast %cst_73 : f32 to vector<8x128xf32>
    %163 = arith.subf %162, %161 : vector<8x128xf32>
    %cst_74 = arith.constant 0.000000e+00 : f32
    %164 = vector.broadcast %cst_74 : f32 to vector<8x128xf32>
    %165 = arith.cmpf oge, %135, %164 : vector<8x128xf32>
    %cst_75 = arith.constant 0.000000e+00 : f32
    %166 = vector.broadcast %cst_75 : f32 to vector<8x128xf32>
    %167 = arith.subf %166, %163 : vector<8x128xf32>
    %168 = arith.select %165, %163, %167 : vector<8x128xi1>, vector<8x128xf32>
    %cst_76 = arith.constant 1.000000e+00 : f32
    %169 = vector.broadcast %cst_76 : f32 to vector<8x128xf32>
    %170 = arith.addf %169, %168 : vector<8x128xf32>
    %171 = arith.mulf %133, %170 : vector<8x128xf32>
    %172 = arith.truncf %171 : vector<8x128xf32> to vector<8x128xbf16>
    %cst_77 = arith.constant dense<0.000000e+00> : vector<8x32xf32>
    %173 = tpu.matmul %172, %25, %cst_77 {dimension_numbers = #tpu.dot_dimension_numbers<[1], [0], [0], [1], [0, 0, 1, 1], [], []>} : vector<8x128xbf16>, vector<128x32xbf16>, vector<8x32xf32> -> vector<8x32xf32>
    %174 = arith.addf %107, %173 : vector<8x32xf32>
    %175 = vector.broadcast %27 : vector<1x32xf32> to vector<8x32xf32>
    %176 = arith.addf %174, %175 : vector<8x32xf32>
    %c0_78 = arith.constant 0 : index
    %c0_79 = arith.constant 0 : index
    %177 = vector.load %arg20[%c0_78, %c0_79] : memref<8x32xf32, #tpu.memory_space<vmem>>, vector<8x32xf32>
    tpu.vector_store %arg20[%c0_78, %c0_79], %176 {strides = array<i32>} : memref<8x32xf32, #tpu.memory_space<vmem>>, vector<8x32xf32>,
    %c1_i32 = arith.constant 1 : i32
    %178 = arith.cmpi eq, %arg1, %c1_i32 : i32
    %179 = arith.extui %178 : i1 to i32
    %c0_i32_80 = arith.constant 0 : i32
    %180 = arith.cmpi ne, %179, %c0_i32_80 : i32
    scf.if %180 {
      %181 = arith.index_cast %arg0 : i32 to index
      %182 = memref.load %arg2[%181] : memref<2xi32, #tpu.memory_space<smem>>
      %183 = arith.index_cast %182 : i32 to index
      %c0_81 = arith.constant 0 : index
      %184 = vector.load %arg20[%183, %c0_81] : memref<8x32xf32, #tpu.memory_space<vmem>>, vector<1x32xf32>
      %c0_82 = arith.constant 0 : index
      %c0_83 = arith.constant 0 : index
      %185 = vector.load %arg16[%c0_82, %c0_83] : memref<1x32xf32, #tpu.memory_space<vmem>>, vector<1x32xf32>
      %c0_84 = arith.constant 0 : index
      %c0_85 = arith.constant 0 : index
      %186 = vector.load %arg17[%c0_84, %c0_85] : memref<1x32xf32, #tpu.memory_space<vmem>>, vector<1x32xf32>
      %c0_86 = arith.constant 0 : index
      %c0_87 = arith.constant 0 : index
      %187 = vector.load %arg18[%c0_86, %c0_87] : memref<32x32xbf16, #tpu.memory_space<vmem>>, vector<32x32xbf16>
      %cst_88 = arith.constant dense<0.000000e+00> : vector<1xf32>
      %188 = vector.multi_reduction <add>, %184, %cst_88 [1] : vector<1x32xf32> to vector<1xf32>
      %189 = vector.shape_cast %188 : vector<1xf32> to vector<1x1xf32>
      %cst_89 = arith.constant 3.200000e+01 : f32
      %190 = vector.broadcast %cst_89 : f32 to vector<1x1xf32>
      %191 = arith.divf %189, %190 : vector<1x1xf32>
      %192 = vector.broadcast %191 : vector<1x1xf32> to vector<1x32xf32>
      %193 = arith.subf %184, %192 : vector<1x32xf32>
      %194 = arith.mulf %193, %193 : vector<1x32xf32>
      %cst_90 = arith.constant dense<0.000000e+00> : vector<1xf32>
      %195 = vector.multi_reduction <add>, %194, %cst_90 [1] : vector<1x32xf32> to vector<1xf32>
      %196 = vector.shape_cast %195 : vector<1xf32> to vector<1x1xf32>
      %cst_91 = arith.constant 3.200000e+01 : f32
      %197 = vector.broadcast %cst_91 : f32 to vector<1x1xf32>
      %198 = arith.divf %196, %197 : vector<1x1xf32>
      %cst_92 = arith.constant 9.99999974E-6 : f32
      %199 = vector.broadcast %cst_92 : f32 to vector<1x1xf32>
      %200 = arith.addf %198, %199 : vector<1x1xf32>
      %201 = math.rsqrt %200 : vector<1x1xf32>
      %202 = vector.broadcast %201 : vector<1x1xf32> to vector<1x32xf32>
      %203 = arith.mulf %193, %202 : vector<1x32xf32>
      %204 = arith.mulf %203, %185 : vector<1x32xf32>
      %205 = arith.addf %204, %186 : vector<1x32xf32>
      %206 = arith.truncf %205 : vector<1x32xf32> to vector<1x32xbf16>
      %cst_93 = arith.constant dense<0.000000e+00> : vector<1x32xf32>
      %207 = tpu.matmul %206, %187, %cst_93 {dimension_numbers = #tpu.dot_dimension_numbers<[1], [0], [0], [1], [0, 0, 1, 1], [], []>} : vector<1x32xbf16>, vector<32x32xbf16>, vector<1x32xf32> -> vector<1x32xf32>
      %208 = arith.mulf %207, %207 : vector<1x32xf32>
      %cst_94 = arith.constant dense<0.000000e+00> : vector<1xf32>
      %209 = vector.multi_reduction <add>, %208, %cst_94 [1] : vector<1x32xf32> to vector<1xf32>
      %210 = vector.shape_cast %209 : vector<1xf32> to vector<1x1xf32>
      %cst_95 = arith.constant 9.99999996E-13 : f32
      %211 = vector.broadcast %cst_95 : f32 to vector<1x1xf32>
      %212 = arith.addf %210, %211 : vector<1x1xf32>
      %213 = math.rsqrt %212 : vector<1x1xf32>
      %214 = vector.broadcast %213 : vector<1x1xf32> to vector<1x32xf32>
      %215 = arith.mulf %207, %214 : vector<1x32xf32>
      %c0_96 = arith.constant 0 : index
      %c0_97 = arith.constant 0 : index
      %c0_98 = arith.constant 0 : index
      %216 = vector.load %arg19[%c0_96, %c0_97, %c0_98] : memref<1x1x32xf32, #tpu.memory_space<vmem>>, vector<1x1x32xf32>
      %217 = vector.shape_cast %216 : vector<1x1x32xf32> to vector<1x32xf32>
      %218 = vector.shape_cast %215 : vector<1x32xf32> to vector<1x1x32xf32>
      tpu.vector_store %arg19[%c0_96, %c0_97, %c0_98], %218 {strides = array<i32>} : memref<1x1x32xf32, #tpu.memory_space<vmem>>, vector<1x1x32xf32>,
    } else {
    }
    return
  }
  func.func @transform_0(%arg0: i32, %arg1: i32, %arg2: memref<2xi32, #tpu.memory_space<smem>>) -> (i32, i32, i32) {
    %c0_i32 = arith.constant 0 : i32
    %c0_i32_0 = arith.constant 0 : i32
    %c0_i32_1 = arith.constant 0 : i32
    return %arg0, %c0_i32, %c0_i32_0 : i32, i32, i32
  }
  func.func @transform_1(%arg0: i32, %arg1: i32, %arg2: memref<2xi32, #tpu.memory_space<smem>>) -> (i32, i32, i32) {
    %c0_i32 = arith.constant 0 : i32
    %c0_i32_0 = arith.constant 0 : i32
    %c0_i32_1 = arith.constant 0 : i32
    return %arg1, %c0_i32, %c0_i32_0 : i32, i32, i32
  }
  func.func @transform_2(%arg0: i32, %arg1: i32, %arg2: memref<2xi32, #tpu.memory_space<smem>>) -> (i32, i32, i32) {
    %c0_i32 = arith.constant 0 : i32
    %c0_i32_0 = arith.constant 0 : i32
    %c0_i32_1 = arith.constant 0 : i32
    return %arg1, %c0_i32, %c0_i32_0 : i32, i32, i32
  }
  func.func @transform_3(%arg0: i32, %arg1: i32, %arg2: memref<2xi32, #tpu.memory_space<smem>>) -> (i32, i32, i32) {
    %c0_i32 = arith.constant 0 : i32
    %c0_i32_0 = arith.constant 0 : i32
    %c0_i32_1 = arith.constant 0 : i32
    return %arg1, %c0_i32, %c0_i32_0 : i32, i32, i32
  }
  func.func @transform_4(%arg0: i32, %arg1: i32, %arg2: memref<2xi32, #tpu.memory_space<smem>>) -> (i32, i32, i32) {
    %c0_i32 = arith.constant 0 : i32
    %c0_i32_0 = arith.constant 0 : i32
    %c0_i32_1 = arith.constant 0 : i32
    return %arg1, %c0_i32, %c0_i32_0 : i32, i32, i32
  }
  func.func @transform_5(%arg0: i32, %arg1: i32, %arg2: memref<2xi32, #tpu.memory_space<smem>>) -> (i32, i32, i32) {
    %c0_i32 = arith.constant 0 : i32
    %c0_i32_0 = arith.constant 0 : i32
    %c0_i32_1 = arith.constant 0 : i32
    return %arg1, %c0_i32, %c0_i32_0 : i32, i32, i32
  }
  func.func @transform_6(%arg0: i32, %arg1: i32, %arg2: memref<2xi32, #tpu.memory_space<smem>>) -> (i32, i32, i32) {
    %c0_i32 = arith.constant 0 : i32
    %c0_i32_0 = arith.constant 0 : i32
    %c0_i32_1 = arith.constant 0 : i32
    return %arg1, %c0_i32, %c0_i32_0 : i32, i32, i32
  }
  func.func @transform_7(%arg0: i32, %arg1: i32, %arg2: memref<2xi32, #tpu.memory_space<smem>>) -> (i32, i32, i32) {
    %c0_i32 = arith.constant 0 : i32
    %c0_i32_0 = arith.constant 0 : i32
    %c0_i32_1 = arith.constant 0 : i32
    return %arg1, %c0_i32, %c0_i32_0 : i32, i32, i32
  }
  func.func @transform_8(%arg0: i32, %arg1: i32, %arg2: memref<2xi32, #tpu.memory_space<smem>>) -> (i32, i32, i32) {
    %c0_i32 = arith.constant 0 : i32
    %c0_i32_0 = arith.constant 0 : i32
    %c0_i32_1 = arith.constant 0 : i32
    return %arg1, %c0_i32, %c0_i32_0 : i32, i32, i32
  }
  func.func @transform_9(%arg0: i32, %arg1: i32, %arg2: memref<2xi32, #tpu.memory_space<smem>>) -> (i32, i32, i32) {
    %c0_i32 = arith.constant 0 : i32
    %c0_i32_0 = arith.constant 0 : i32
    %c0_i32_1 = arith.constant 0 : i32
    return %arg1, %c0_i32, %c0_i32_0 : i32, i32, i32
  }
  func.func @transform_10(%arg0: i32, %arg1: i32, %arg2: memref<2xi32, #tpu.memory_space<smem>>) -> (i32, i32, i32) {
    %c0_i32 = arith.constant 0 : i32
    %c0_i32_0 = arith.constant 0 : i32
    %c0_i32_1 = arith.constant 0 : i32
    return %arg1, %c0_i32, %c0_i32_0 : i32, i32, i32
  }
  func.func @transform_11(%arg0: i32, %arg1: i32, %arg2: memref<2xi32, #tpu.memory_space<smem>>) -> (i32, i32, i32) {
    %c0_i32 = arith.constant 0 : i32
    %c0_i32_0 = arith.constant 0 : i32
    %c0_i32_1 = arith.constant 0 : i32
    return %arg1, %c0_i32, %c0_i32_0 : i32, i32, i32
  }
  func.func @transform_12(%arg0: i32, %arg1: i32, %arg2: memref<2xi32, #tpu.memory_space<smem>>) -> (i32, i32, i32) {
    %c0_i32 = arith.constant 0 : i32
    %c0_i32_0 = arith.constant 0 : i32
    %c0_i32_1 = arith.constant 0 : i32
    return %arg1, %c0_i32, %c0_i32_0 : i32, i32, i32
  }
  func.func @transform_13(%arg0: i32, %arg1: i32, %arg2: memref<2xi32, #tpu.memory_space<smem>>) -> (i32, i32) {
    %c0_i32 = arith.constant 0 : i32
    %c0_i32_0 = arith.constant 0 : i32
    %c0_i32_1 = arith.constant 0 : i32
    return %c0_i32, %c0_i32_0 : i32, i32
  }
  func.func @transform_14(%arg0: i32, %arg1: i32, %arg2: memref<2xi32, #tpu.memory_space<smem>>) -> (i32, i32) {
    %c0_i32 = arith.constant 0 : i32
    %c0_i32_0 = arith.constant 0 : i32
    %c0_i32_1 = arith.constant 0 : i32
    return %c0_i32, %c0_i32_0 : i32, i32
  }
  func.func @transform_15(%arg0: i32, %arg1: i32, %arg2: memref<2xi32, #tpu.memory_space<smem>>) -> (i32, i32) {
    %c0_i32 = arith.constant 0 : i32
    %c0_i32_0 = arith.constant 0 : i32
    %c0_i32_1 = arith.constant 0 : i32
    return %c0_i32, %c0_i32_0 : i32, i32
  }
  func.func @transform_16(%arg0: i32, %arg1: i32, %arg2: memref<2xi32, #tpu.memory_space<smem>>) -> (i32, i32, i32) {
    %c0_i32 = arith.constant 0 : i32
    %c0_i32_0 = arith.constant 0 : i32
    %c0_i32_1 = arith.constant 0 : i32
    return %arg0, %c0_i32, %c0_i32_0 : i32, i32, i32
  }
}

</mosaic_0001>

<bundles_post_ra>
// kernel: clip_forward.3
= control target key start
LH: loop header
LB: loop body
LE: loop exit
PB: predicated region body
PF: predicated region fallthrough
CT: control target
= control target key end

     0   :  { %s2488_s0 = inlined_call_operand.vmem [shape: s32[2], index: 0, kind: input, shape index: {}]   ;;  %s2489_s1 = inlined_call_operand.vmem [shape: f32[2,8,32], index: 1, kind: input, shape index: {}]   ;;  %s2490_s2 = inlined_call_operand.vmem [shape: f32[2,1,32], index: 2, kind: input, shape index: {}]   ;;  %s2491_s3 = inlined_call_operand.vmem [shape: f32[2,1,32], index: 3, kind: input, shape index: {}]   ;;  %s2492_s4 = inlined_call_operand.vmem [shape: bf16[2,32,96], index: 4, kind: input, shape index: {}]   ;;  %s2493_s5 = inlined_call_operand.vmem [shape: f32[2,1,96], index: 5, kind: input, shape index: {}]   ;;  %s2494_s6 = inlined_call_operand.vmem [shape: bf16[2,32,32], index: 6, kind: input, shape index: {}]   ;;  %s2495_s7 = inlined_call_operand.vmem [shape: f32[2,1,32], index: 7, kind: input, shape index: {}]   ;;  %s2496_s8 = inlined_call_operand.vmem [shape: f32[2,1,32], index: 8, kind: input, shape index: {}]   ;;  %s2497_s9 = inlined_call_operand.vmem [shape: f32[2,1,32], index: 9, kind: input, shape index: {}]   ;;  %s2498_s10 = inlined_call_operand.vmem [shape: bf16[2,32,128], index: 10, kind: input, shape index: {}]   ;;  %s2499_s11 = inlined_call_operand.vmem [shape: f32[2,1,128], index: 11, kind: input, shape index: {}]   ;;  %s2500_s12 = inlined_call_operand.vmem [shape: bf16[2,128,32], index: 12, kind: input, shape index: {}]   ;;  %s2501_s13 = inlined_call_operand.vmem [shape: f32[2,1,32], index: 13, kind: input, shape index: {}]   ;;  %s2502_s14 = inlined_call_operand.vmem [shape: f32[1,32], index: 14, kind: input, shape index: {}]   ;;  %s2503_s15 = inlined_call_operand.vmem [shape: f32[1,32], index: 15, kind: input, shape index: {}]   ;;  %s2504_s16 = inlined_call_operand.vmem [shape: bf16[32,32], index: 16, kind: input, shape index: {}]   ;;  %s2505_s17 = inlined_call_operand.hbm [shape: f32[2,1,32], index: 17, kind: output, shape index: {}]  }
   0x1   :  { %2520 = sst [smem:[#allocation21_spill]] %s2488_s0 }
   0x2   :  { %2521 = sst [smem:[#allocation22_spill]] %s2489_s1 }
   0x3   :  { %2522 = sst [smem:[#allocation23_spill]] %s2491_s3 }
   0x4   :  { %2523 = sst [smem:[#allocation24_spill]] %s2492_s4 }
   0x5   :  { %2524 = sst [smem:[#allocation25_spill]] %s2494_s6 }
   0x6   :  { %2525 = sst [smem:[#allocation26_spill]] %s2499_s11 }
   0x7   :  { %2526 = sst [smem:[#allocation27_spill]] %s2502_s14 }
   0x8   :  { %2527 = sst [smem:[#allocation28_spill]] %s2503_s15 }
   0x9   :  { %2528 = sst [smem:[#allocation29_spill]] %s2504_s16 }
   0xa   :  { %2529 = sst [smem:[#allocation30_spill]] %s2505_s17 }
   0xb   :  { %s2530_s26 = sld [smem:[#allocation21_spill]] }
  0x11   :  { %s22_s11 = sshll.u32 %s2530_s26, 4  ;;  %s23_s11 = int_to_ptr.vmem [resolvable:$true] %s22_s11 }
  0x12   :  { %s1950_s27 = scalar_lea.vmem %s23_s11, 16  ;;  %p1955_p1 = scmp.lt.s32.totalorder %s23_s11, %s23_s11 }
  0x13   :  { %p1951_p0 = scmp.ne.s32.totalorder %s23_s11, %s1950_s27  ;;  %p1956_p2 = scmp.lt.s32.totalorder %s1950_s27, %s1950_s27 }
  0x15   :  { %p1957_p3 = por %p1956_p2, %p1955_p1 }
  0x17   :  { %p1958_p4 = pnand %p1957_p3, %p1951_p0 }
  0x19   :  { %1961 = shalt.err (!%p1958_p4)  }
  0x1a   :  { %s2058_s28 = smov [#allocation4]  }
  0x1b   :  { %25 = dma.vmem_to_smem %s23_s11, 16, %s2058_s28, [#allocation3] }
  0x1c   :  { %2020 = dma.done.wait [#allocation3], 16 }
  0x1d   :  { %2021 = vsyncadd [#allocation3], 4294967280 }
  0x1e   :  { %27 = sfence }
  0x1f   :  { %28 = vsyncpa [#allocation6], 0 }
  0x20   :  { %30 = vsyncpa [#allocation6 + $0x1], 0  ;;  %s2164_s29 = smov 0   ;;  %s2166_s0 = smov 0  }
  0x21   :  { %s2168_s30 = smov 0   ;;  %s2170_s18 = smov 0  }
  0x22   :  { %s2172_s19 = smov 0   ;;  %s2174_s1 = smov 0  }
  0x23   :  { %s2176_s20 = smov 0   ;;  %s2178_s11 = smov 0  }
  0x24 LB: > { %2531 = sst [smem:[#allocation9_spill]] %s2028_s29  ;;  %s1671_s21 = sadd.s32 4294967295, %s2056_s11   ;;  %s2056_s11 = sphi %s2178_s11, %s36_s11   ;;  %s2052_s20 = sphi %s2176_s20, %s2575_s20   ;;  %s2048_s1 = sphi %s2174_s1, %s2574_s1   ;;  %s2044_s19 = sphi %s2172_s19, %s2573_s19   ;;  %s2040_s18 = sphi %s2170_s18, %s2572_s18   ;;  %s2036_s30 = sphi %s2168_s30, %s2571_s30   ;;  %s2032_s0 = sphi %s2166_s0, %s2577_s0   ;;  %s2028_s29 = sphi %s2164_s29, %s2576_s29  }
  0x25   : > { %2532 = sst [smem:[#allocation10_spill]] %s2036_s30  ;;  %s1672_s22 = sadd.s32 4294967294, %s2056_s11  }
  0x26   : > { %2533 = sst [smem:[#allocation11_spill]] %s2044_s19  ;;  %s45_s23 = sadd.s32 1, %s2048_s1 }
  0x27   : > { %2534 = sst [smem:[#allocation12_spill]] %s2048_s1  ;;  %p46_p5 = scmp.ge.s32.totalorder %s45_s23, 2 }
  0x28   : > { %2535 = sst [smem:[#allocation13_spill]] %s2052_s20  ;;  %s48_s24 = sadd.s32 1, %s2052_s20 }
  0x29   : > { %2536 = sst [smem:[#allocation14_spill]] %s2056_s11  ;;  %p466_p6 = scmp.ne.s32.totalorder %s2036_s30, %s2032_s0 }
  0x2a   : > { %p467_p7 = scmp.eq.s32.totalorder %s1671_s21, 3  ;;  %s2579_s23 = smov (%p46_p5, %s45_s23), 0 }
  0x2b   : > { %2537 = sst [smem:[#allocation15_spill]] %s2579_s23  ;;  %s2581_s24 = smov (!%p46_p5, %s48_s24), %s2052_s20 }
  0x2c   : > { %p2213_p8 = por %p467_p7, %p466_p6  ;;  %p472_p9 = scmp.ne.s32.totalorder %s2032_s0, %s2028_s29 }
  0x2d   : > { %p50_p10 = scmp.ge.s32.totalorder %s2581_s24, 2  ;;  %p473_p11 = scmp.eq.s32.totalorder %s1672_s22, 3 }
  0x2e   : > { %s2538_s25 = scalar_select %p2213_p8, 1, 0 }
  0x2f   : > { %p1675_p12 = scmp.ge.s32.totalorder %s2056_s11, 1  ;;  %p587_p13 = scmp.lt.s32.totalorder %s2056_s11, 5 }
  0x30   : > { %2539 = sst [smem:[#allocation16_spill]] %s2538_s25  ;;  %s2583_s24 = smov (%p50_p10, %s2581_s24), 0 }
  0x31   : > { %2540 = sst [smem:[#allocation17_spill]] %s2583_s24  ;;  %p2223_p0 = por %p473_p11, %p472_p9 }
  0x32   : > { %p588_p1 = pnand %p1675_p12, %p587_p13  ;;  %s453_s27 = ssub.s32 %s2052_s20, %s2583_s24 }
  0x33   : > { %s2541_s26 = scalar_select %p2223_p0, 1, 0 }
  0x34   : > { %s456_s28 = sadd.s32 1, %s2036_s30  ;;  %p454_p2 = scmp.eq.s32.totalorder %s453_s27, 0 }
  0x35   : > { %2542 = sst [smem:[#allocation18_spill]] %s2541_s26  ;;  %591 = sbr.rel (%p588_p1) target bundleno = 3037 (0xbdd), region = 84 }
  0x36   : > { %s2231_s21 = scalar_select %p454_p2, %s2036_s30, %s456_s28  }
  0x38   : > { %2543 = sst [smem:[#allocation19_spill]] %s2231_s21 }
  0x3a   : > { %p679_p3 = scmp.lt.s32.totalorder %s2044_s19, 1  ;;  %p683_p4 = scmp.lt.s32.totalorder %s2040_s18, 1 }
  0x3b   : > { %s2544_s20 = sld [smem:[#allocation22_spill]]  ;;  %s2550_s14 = sand.u32 1, %s2032_s0  }
  0x3c   : > { %s680_s23 = scalar_select %p679_p3, %s2044_s19, 1 }
  0x3d   : > { %s2238_s1 = scalar_select %p683_p4, %s2040_s18, 1 }
  0x3e   : > { %s1676_s27 = sshll.u32 %s680_s23, 3  ;;  %s2546_s4 = sld [smem:[#allocation24_spill]] }
  0x3f   : > { %s1722_s25 = sshll.u32 %s2238_s1, 4  ;;  %s2547_s6 = sld [smem:[#allocation25_spill]] }
  0x40   : > { %s2281_s23 = scalar_lea.vmem %s2498_s10, %s1722_s25  ;;  %s2549_s24 = sld [smem:[#allocation26_spill]] }
  0x41   : > { %s682_s22 = scalar_lea.vmem %s2544_s20, %s1676_s27  ;;  %s726_s29 = scalar_lea.vmem %s2501_s13, %s2238_s1 }
  0x42   : > { %s2299_s15 = scalar_lea.vmem [#allocation5], %s2550_s14  ;;  %p1685_p5 = scmp.ne.s32.totalorder %s2040_s18, 0 }
  0x44   : > { %s2255_s16 = scalar_lea.vmem %s2546_s4, %s1722_s25  ;;  %s710_s4 = scalar_lea.vmem %s2497_s9, %s2238_s1 }
  0x45   : > { %s2264_s27 = scalar_lea.vmem %s2547_s6, %s1722_s25  ;;  %731 = sbr.rel (%p1685_p5) target bundleno = 76 (0x4c), region = 88 }
  0x46   : > { %2548 = sst [smem:[#allocation20_spill]] %s2264_s27  ;;  %s718_s6 = scalar_lea.vmem %s2549_s24, %s2238_s1 }
  0x47   : > { %s1725_s27 = sshll.u32 %s2238_s1, 6 }
  0x48   : > { %s2295_s26 = scalar_lea.vmem %s2500_s12, %s1725_s27 }
  0x4a   : > { %v732_v0 = vld [vmem:[%s682_s22] sm:$0xff]  ;;  %vm733_vm0 = vcmask 261120  }
  0x4b   : > { %734 = vst.msk [vmem:[#allocation2] sm:$0xff] %vm733_vm0, %v732_v0 }
  0x4c PF: > { %vm772_vm1 = vcmask 261120   ;;  %v1914_v8 = vld [vmem:[%s2255_s16 + $0x8] sm:$0xff]   ;;  %v2059_v9 = vmov 0.0   ;;  %vm2060_vm2 = vmmov 0   ;;  %v1915_v10 = vld [vmem:[%s2255_s16] sm:$0xff]   ;;  %s2551_s16 = scalar_lea.vmem %s2490_s2, %s2238_s1  ;;  %s2552_s27 = sld [smem:[#allocation23_spill]]  ;;  %v863_v35 = vlaneseq }
  0x4d   : > { %1755 = vmatprep.subr.bf16.mxu0 %v2059_v9  ;;  %1759 = vmatprep.mubr.msk.bf16.mxu0 %vm2060_vm2, %v2059_v9  ;;  %v1686_v15 = vld [vmem:[%s2551_s16] ss:$0 sm:$0xff]  ;;  %s2554_s30 = scalar_lea.vmem %s2493_s5, %s2238_s1  ;;  %s2061_s21 = smov 96   ;;  %vm875_vm3 = vcmask 130048   ;;  %v2064_v38 = vmov -1e+30  }
  0x4e   : > { %1756 = vmatpush3.bf16.msra.mxu0 %v1914_v8  ;;  %1775 = vmatprep.subr.bf16.mxu1 %v2059_v9  ;;  %v1688_v21 = vld [vmem:[%s2554_s30] ss:$0 sm:$0xff]  ;;  %s2062_s17 = smov 112   ;;  %s2063_s11 = smov 80   ;;  %v864_v36 = vshrl.u32 %v863_v35, 7  ;;  %v866_v37 = vand.u32 127, %v863_v35 }
  0x4f   : > { %1757 = vmatprep.subr.bf16.mxu0 %v2059_v9  ;;  %1777 = vmatprep.mubr.msk.bf16.mxu1 %vm2060_vm2, %v2059_v9  ;;  %vm922_vm5 = vcmask 64512   ;;  %s2065_s14 = smov 64   ;;  %s2066_s3 = smov 48   ;;  %vm939_vm6 = vcmask 1043456  }
  0x50   : > { %vm867_vm4 = vcmp.le.s32.totalorder %v866_v37, %v864_v36  ;;  %s2555_s25 = sld [smem:[#allocation20_spill]]  ;;  %s2067_s16 = smov 16  }
  0x51   : > { %v868_v39 = vsel %vm867_vm4, 0.0, %v2064_v38  ;;  %v1919_v38 = vld [vmem:[%s2281_s23] sm:$0xff]   ;;  %s2557_s20 = scalar_lea.vmem %s2496_s8, %s2238_s1  ;;  %p1715_p6 = scmp.ne.s32.totalorder %s2040_s18, 1 }
  0x52   : > { %v2302_v1 = vld [vmem:[#allocation2] sm:$0xff]  ;;  %1758 = vmatpush3.bf16.msra.mxu0 %v1915_v10  ;;  %s2553_s19 = scalar_lea.vmem %s2552_s27, %s2238_s1  ;;  %s2556_s27 = scalar_lea.vmem %s2495_s7, %s2238_s1 }
  0x53   : > { %v773_v2 = vsel %vm772_vm1, %v2302_v1, 0.0  ;;  %1763 = vmatprep.subr.bf16.mxu0 %v2059_v9  ;;  %v1687_v17 = vld [vmem:[%s2553_s19] ss:$0 sm:$0xff] }
  0x54   : > { %774 = vadd.xlane.f32.xlu0 %v773_v2 }
  0xdd   : > { %v775_v3 = vpop.xlane.xlu0 %774 }
  0xde   : > { %v777_v4 = vmul.f32 0.03125, %v775_v3 }
  0xe0   : > { %v778_v5 = vsub.f32 %v2302_v1, %v777_v4 }
  0xe2   : > { %v779_v6 = vmul.f32 %v778_v5, %v778_v5 }
  0xe4   : > { %v780_v7 = vsel %vm772_vm1, %v779_v6, 0.0 }
  0xe5   : > { %781 = vadd.xlane.f32.xlu0 %v780_v7  ;;  %v1917_v7 = vld [vmem:[%s2555_s25] sm:$0xff]  }
 0x16e   : > { %v782_v11 = vpop.xlane.xlu0 %781 }
 0x16f   : > { %v783_v12 = vmul.f32 0.03125, %v782_v11 }
 0x171   : > { %v784_v13 = vadd.f32 1e-05, %v783_v12 }
 0x173   : > { %1928 = vrsqrt.f32 %v784_v13 }
 0x180   : > { %v1929_v14 = vpop.eup %1928 }
 0x181   : > { %v786_v16 = vmul.f32 %v1929_v14, %v778_v5  ;;  %v1916_v5 = vld [vmem:[%s2555_s25 + $0x8] sm:$0xff]   ;;  %s2560_s25 = sld [smem:[#allocation29_spill]] (!%p1715_p6) }
 0x183   : > { %v793_v18 = vmul.f32 %v1686_v15, %v786_v16 }
 0x185   : > { %v800_v19 = vadd.f32 %v1687_v17, %v793_v18 }
 0x187   : > { %v801_v20 = vpack.c.bf16 %v800_v19, %v800_v19 }
 0x189   : > { %1760 = vmatmul.mubr.msk.bf16.vlgmr.msra.gmra.mxu0 %vm772_vm1, %v801_v20 }
 0x18a   : > { %1765 = vmatprep.mubr.msk.bf16.mxu0 %vm2060_vm2, %v2059_v9 }
 0x249   : > { %v857_v22 = vpop.f32.mrf.mxu0 }
 0x24a   : > { %v858_v23 = vadd.f32 %v1688_v21, %v857_v22 }
 0x24b   : > { %v1761_v24 = vpop.f32.mrf.mxu0 }
 0x24c   : > { %v869_v25 = vmul.f32 0.25, %v858_v23  ;;  %v871_v26 = vpack.c.bf16 %v858_v23, %v858_v23 }
 0x24d   : > { %v860_v27 = vpop.f32.mrf.mxu0 }
 0x24e   : > { %v870_v28 = vpack.c.bf16 %v869_v25, %v869_v25  ;;  %873 = vrot.lane.b32.xlu1 %v871_v26, %s2061_s21  ;;  %v1699_v25 = vld [vmem:[%s2556_s27] ss:$0 sm:$0xff]  ;;  %s2561_s27 = sld [smem:[#allocation27_spill]] (!%p1715_p6) }
 0x24f   : > { %v1762_v29 = vpop.f32.mrf.mxu0 }
 0x250   : > { %985 = vrot.lane.b32.xlu0 %v870_v28, %s2062_s17 }
 0x252   : > { %987 = vrot.lane.b32.xlu1 %v871_v26, %s2063_s11  ;;  %s2559_s11 = sld [smem:[#allocation11_spill]] (!%p1715_p6) }
 0x2c0   : > { %v874_v30 = vpop.permute.xlu1 %873 }
 0x2c1   : > { %v880_v31 = vsel %vm875_vm3, %v874_v30, 0 }
 0x2c2   : > { %1764 = vmatpush3.bf16.xpose.msra.mxu0 %v880_v31  ;;  %v986_v34 = vpop.permute.xlu0 %985 }
 0x2c3   : > { %1769 = vmatprep.subr.bf16.mxu0 %v2059_v9 }
 0x2c4   : > { %v988_v32 = vpop.permute.xlu1 %987 }
 0x2c5   : > { %v993_v33 = vsel %vm875_vm3, %v988_v32, 0 }
 0x2c6   : > { %1776 = vmatpush3.bf16.xpose.msra.mxu1 %v993_v33 }
 0x2c7   : > { %1787 = vmatprep.subr.bf16.mxu1 %v2059_v9 }
 0x2c9   : > { %1766 = vmatmul.mubr.msk.bf16.vlgmr.msra.gmra.mxu0 %vm875_vm3, %v870_v28 }
 0x2ca   : > { %1771 = vmatprep.mubr.msk.bf16.mxu0 %vm2060_vm2, %v2059_v9 }
 0x2cd   : > { %1778 = vmatmul.mubr.msk.bf16.vlgmr.msra.gmra.mxu1 %vm875_vm3, %v986_v34 }
 0x2ce   : > { %1791 = vmatprep.mubr.msk.bf16.mxu1 %vm2060_vm2, %v2059_v9  ;;  %1788 = vmatpush3.bf16.msra.mxu1 %v1916_v5 }
 0x2cf   : > { %1789 = vmatprep.subr.bf16.mxu1 %v2059_v9 }
 0x2d2   : > { %1790 = vmatpush3.bf16.msra.mxu1 %v1917_v7 }
 0x2d3   : > { %1803 = vmatprep.subr.bf16.mxu1 %v2059_v9 }
 0x389   : > { %v916_v40 = vpop.f32.mrf.mxu0 }
 0x38a   : > { %v917_v41 = vadd.f32 %v916_v40, %v868_v39 }
 0x38b   : > { %v1767_v42 = vpop.f32.mrf.mxu0 }
 0x38c   : > { %v923_v43 = vsel %vm922_vm5, %v917_v41, -inf }
 0x38d   : > { %v1029_v44 = vpop.f32.mrf.mxu1  ;;  %924 = vmax.xlane.f32.xlu1 %v923_v43  ;;  %v919_v45 = vpop.f32.mrf.mxu0  ;;  %v1700_v43 = vld [vmem:[%s2557_s20] ss:$0 sm:$0xff]  ;;  %s2562_s20 = sld [smem:[#allocation28_spill]] (!%p1715_p6) }
 0x38e   : > { %v1030_v46 = vadd.f32 %v1029_v44, %v868_v39  ;;  %v1701_v45 = vld [vmem:[%s710_s4] ss:$0 sm:$0xff] }
 0x38f   : > { %v1768_v47 = vpop.f32.mrf.mxu0  ;;  %v1779_v48 = vpop.f32.mrf.mxu1 }
 0x390   : > { %v1035_v49 = vsel %vm922_vm5, %v1030_v46, -inf }
 0x391   : > { %1036 = vmax.xlane.f32.xlu0 %v1035_v49  ;;  %v1032_v50 = vpop.f32.mrf.mxu1  ;;  %v1920_v49 = vld [vmem:[%s2295_s26 + $0x38] sm:$0xff]  }
 0x392   : > { %v1921_v50 = vld [vmem:[%s2295_s26 + $0x30] sm:$0xff]  }
 0x393   : > { %v1780_v51 = vpop.f32.mrf.mxu1 }
 0x394   : > { %v1922_v51 = vld [vmem:[%s2295_s26 + $0x28] sm:$0xff]  }
 0x39e   : > { %934 = vrot.lane.b32.xlu1 %v871_v26, %s2065_s14  ;;  %s1382_s14 = sld [smem:[#allocation4 + %s2559_s11]] (!%p1715_p6) }
 0x3a7   : > { %1046 = vrot.lane.b32.xlu0 %v871_v26, %s2066_s3  ;;  %s1383_s3 = scalar_lea.vmem (!%p1715_p6), [#allocation2], %s1382_s14 }
 0x416   : > { %v925_v52 = vpop.xlane.xlu1 %924 }
 0x417   : > { %v926_v53 = vsub.f32 %v917_v41, %v925_v52  ;;  %v1923_v52 = vld [vmem:[%s2295_s26 + $0x20] sm:$0xff]  }
 0x419   : > { %v927_v54 = vmul.f32 1.442695, %v926_v53  ;;  %v1924_v53 = vld [vmem:[%s2295_s26 + $0x18] sm:$0xff]  }
 0x41a   : > { %v1037_v55 = vpop.xlane.xlu0 %1036  ;;  %v935_v56 = vpop.permute.xlu1 %934 }
 0x41b   : > { %1930 = vpow2.f32 %v927_v54  ;;  %v1038_v57 = vsub.f32 %v1030_v46, %v1037_v55  ;;  %v941_v58 = vsel %vm939_vm6, %v935_v56, 0  ;;  %v1925_v54 = vld [vmem:[%s2295_s26 + $0x10] sm:$0xff]   ;;  %v1926_v55 = vld [vmem:[%s2295_s26 + $0x8] sm:$0xff]   ;;  %v1927_v56 = vld [vmem:[%s2295_s26] sm:$0xff]  }
 0x41c   : > { %1770 = vmatpush3.bf16.msra.mxu0 %v941_v58 }
 0x41d   : > { %v1039_v59 = vmul.f32 1.442695, %v1038_v57  ;;  %1781 = vmatprep.subr.bf16.mxu0 %v2059_v9  ;;  %v1702_v57 = vld [vmem:[%s718_s6] ss:$0 sm:$0xff] }
 0x41e   : > { %v1047_v61 = vpop.permute.xlu0 %1046 }
 0x41f   : > { %1932 = vpow2.f32 %v1039_v59  ;;  %v1052_v0 = vsel %vm939_vm6, %v1047_v61, 0 }
 0x428   : > { %v1931_v60 = vpop.eup %1930 }
 0x429   : > { %v929_v62 = vsel %vm922_vm5, %v1931_v60, 0.0  ;;  %v933_v63 = vpack.c.bf16 %v1931_v60, %v1931_v60 }
 0x42a   : > { %930 = vadd.xlane.f32.xlu0 %v929_v62 }
 0x42b   : > { %1772 = vmatmul.mubr.msk.bf16.vlgmr.msra.gmra.mxu0 %vm922_vm5, %v933_v63 }
 0x42c   : > { %v1933_v2 = vpop.eup %1932  ;;  %1782 = vmatpush3.bf16.msra.mxu0 %v1052_v0  ;;  %1783 = vmatprep.mubr.msk.bf16.mxu0 %vm2060_vm2, %v2059_v9 }
 0x42d   : > { %v1041_v3 = vsel %vm922_vm5, %v1933_v2, 0.0  ;;  %1795 = vmatprep.subr.bf16.mxu0 %v2059_v9  ;;  %v1045_v4 = vpack.c.bf16 %v1933_v2, %v1933_v2 }
 0x42e   : > { %1042 = vadd.xlane.f32.xlu1 %v1041_v3 }
 0x433   : > { %1784 = vmatmul.mubr.msk.bf16.vlgmr.msra.gmra.mxu0 %vm922_vm5, %v1045_v4 }
 0x434   : > { %1799 = vmatprep.mubr.msk.bf16.mxu0 %vm2060_vm2, %v2059_v9 }
 0x4b3   : > { %v931_v19 = vpop.xlane.xlu0 %930 }
 0x4b7   : > { %v1043_v6 = vpop.xlane.xlu1 %1042 }
 0x4b8   : > { %1934 = vrcp.f32 %v1043_v6 }
 0x4b9   : > { %1936 = vrcp.f32 %v931_v19 }
 0x4c5   : > { %v1935_v13 = vpop.eup %1934 }
 0x4c6   : > { %v1937_v20 = vpop.eup %1936 }
 0x4eb   : > { %v977_v8 = vpop.f32.mrf.mxu0 }
 0x4ec   : > { %v983_v21 = vmul.f32 %v1937_v20, %v977_v8 }
 0x4ed   : > { %v1773_v10 = vpop.f32.mrf.mxu0 }
 0x4ef   : > { %v980_v11 = vpop.f32.mrf.mxu0 }
 0x4f1   : > { %v1774_v12 = vpop.f32.mrf.mxu0 }
 0x4f3   : > { %v1088_v14 = vpop.f32.mrf.mxu0 }
 0x4f4   : > { %v1094_v15 = vmul.f32 %v1935_v13, %v1088_v14 }
 0x4f5   : > { %v1785_v16 = vpop.f32.mrf.mxu0 }
 0x4f6   : > { %1096 = vrot.lane.b32.xlu1 %v1094_v15, %s2067_s16 }
 0x4f7   : > { %v1091_v17 = vpop.f32.mrf.mxu0 }
 0x4f9   : > { %v1786_v18 = vpop.f32.mrf.mxu0 }
 0x568   : > { %v1097_v22 = vpop.permute.xlu1 %1096 }
 0x569   : > { %v1099_v23 = vsel %vm875_vm3, %v983_v21, %v1097_v22 }
 0x56a   : > { %v1100_v24 = vpack.c.bf16 %v1099_v23, %v1099_v23 }
 0x56c   : > { %1792 = vmatmul.mubr.msk.bf16.vlgmr.msra.gmra.mxu1 %vm772_vm1, %v1100_v24 }
 0x56d   : > { %1819 = vmatprep.mubr.msk.bf16.mxu1 %vm2060_vm2, %v2059_v9  ;;  %1804 = vmatpush3.bf16.msra.mxu1 %v1920_v49 }
 0x56e   : > { %1805 = vmatprep.subr.bf16.mxu1 %v2059_v9 }
 0x571   : > { %1806 = vmatpush3.bf16.msra.mxu1 %v1921_v50 }
 0x572   : > { %1807 = vmatprep.subr.bf16.mxu1 %v2059_v9 }
 0x575   : > { %1808 = vmatpush3.bf16.msra.mxu1 %v1922_v51 }
 0x576   : > { %1809 = vmatprep.subr.bf16.mxu1 %v2059_v9 }
 0x579   : > { %1810 = vmatpush3.bf16.msra.mxu1 %v1923_v52 }
 0x57a   : > { %1811 = vmatprep.subr.bf16.mxu1 %v2059_v9 }
 0x57d   : > { %1812 = vmatpush3.bf16.msra.mxu1 %v1924_v53 }
 0x57e   : > { %1813 = vmatprep.subr.bf16.mxu1 %v2059_v9 }
 0x581   : > { %1814 = vmatpush3.bf16.msra.mxu1 %v1925_v54 }
 0x582   : > { %1815 = vmatprep.subr.bf16.mxu1 %v2059_v9 }
 0x585   : > { %1816 = vmatpush3.bf16.msra.mxu1 %v1926_v55 }
 0x586   : > { %1817 = vmatprep.subr.bf16.mxu1 %v2059_v9 }
 0x589   : > { %1818 = vmatpush3.bf16.msra.mxu1 %v1927_v56 }
 0x62c   : > { %v1150_v26 = vpop.f32.mrf.mxu1 }
 0x62d   : > { %v1156_v27 = vadd.f32 %v1150_v26, %v2302_v1  ;;  %v1918_v1 = vld [vmem:[%s2281_s23 + $0x8] sm:$0xff]   ;;  %v1714_v26 = vld [vmem:[%s726_s29] ss:$0 sm:$0xff] }
 0x62e   : > { %v1793_v28 = vpop.f32.mrf.mxu1  ;;  %1796 = vmatpush3.bf16.msra.mxu0 %v1918_v1 }
 0x62f   : > { %v2374_v29 = vadd.f32 %v1699_v25, %v1156_v27  ;;  %1797 = vmatprep.subr.bf16.mxu0 %v2059_v9 }
 0x630   : > { %v1153_v30 = vpop.f32.mrf.mxu1 }
 0x631   : > { %v1164_v31 = vsel %vm772_vm1, %v2374_v29, 0.0 }
 0x632   : > { %1165 = vadd.xlane.f32.xlu0 %v1164_v31  ;;  %v1794_v32 = vpop.f32.mrf.mxu1  ;;  %1798 = vmatpush3.bf16.msra.mxu0 %v1919_v38 }
 0x6bb   : > { %v1166_v33 = vpop.xlane.xlu0 %1165 }
 0x6bc   : > { %v1167_v34 = vmul.f32 0.03125, %v1166_v33 }
 0x6be   : > { %v1168_v35 = vsub.f32 %v2374_v29, %v1167_v34 }
 0x6c0   : > { %v1169_v36 = vmul.f32 %v1168_v35, %v1168_v35 }
 0x6c2   : > { %v1170_v37 = vsel %vm772_vm1, %v1169_v36, 0.0 }
 0x6c3   : > { %1171 = vadd.xlane.f32.xlu1 %v1170_v37 }
 0x74c   : > { %v1172_v39 = vpop.xlane.xlu1 %1171 }
 0x74d   : > { %v1173_v40 = vmul.f32 0.03125, %v1172_v39 }
 0x74f   : > { %v1174_v41 = vadd.f32 1e-05, %v1173_v40 }
 0x751   : > { %1938 = vrsqrt.f32 %v1174_v41 }
 0x75e   : > { %v1939_v42 = vpop.eup %1938 }
 0x75f   : > { %v1176_v44 = vmul.f32 %v1939_v42, %v1168_v35 }
 0x761   : > { %v1183_v46 = vmul.f32 %v1700_v43, %v1176_v44 }
 0x763   : > { %v1190_v47 = vadd.f32 %v1701_v45, %v1183_v46 }
 0x765   : > { %v1191_v48 = vpack.c.bf16 %v1190_v47, %v1190_v47 }
 0x767   : > { %1800 = vmatmul.mubr.msk.bf16.vlgmr.msra.gmra.mxu0 %vm772_vm1, %v1191_v48 }
 0x827   : > { %v1247_v58 = vpop.f32.mrf.mxu0 }
 0x828   : > { %v1248_v59 = vadd.f32 %v1702_v57, %v1247_v58 }
 0x829   : > { %v1801_v60 = vpop.f32.mrf.mxu0 }
 0x82a   : > { %v1254_v61 = vmul.f32 0.70710677, %v1248_v59  ;;  %v1253_v22 = vmul.f32 0.5, %v1248_v59 }
 0x82b   : > { %v1250_v62 = vpop.f32.mrf.mxu0 }
 0x82c   : > { %v1255_v63 = vand.u32 2147483647, %v1254_v61  ;;  %vm1275_vm7 = vcmp.ge.f32.partialorder %v1254_v61, 0.0 }
 0x82d   : > { %v1802_v0 = vpop.f32.mrf.mxu0 }
 0x82e   : > { %v1256_v2 = vmul.f32 0.3275911, %v1255_v63  ;;  %v1269_v4 = vsub.f32 0.0, %v1255_v63 }
 0x830   : > { %v1257_v3 = vadd.f32 1.0, %v1256_v2  ;;  %v1270_v5 = vmul.f32 %v1269_v4, %v1255_v63 }
 0x832   : > { %1940 = vrcp.f32 %v1257_v3  ;;  %v1271_v7 = vmul.f32 1.442695, %v1270_v5 }
 0x834   : > { %1942 = vpow2.f32 %v1271_v7 }
 0x83f   : > { %v1941_v9 = vpop.eup %1940 }
 0x840   : > { %v1260_v6 = vmul.f32 1.0614054, %v1941_v9 }
 0x841   : > { %v1943_v17 = vpop.eup %1942 }
 0x842   : > { %v1261_v8 = vadd.f32 -1.4531521, %v1260_v6 }
 0x844   : > { %v1262_v10 = vmul.f32 %v1941_v9, %v1261_v8 }
 0x846   : > { %v1263_v11 = vadd.f32 1.4214138, %v1262_v10 }
 0x848   : > { %v1264_v12 = vmul.f32 %v1941_v9, %v1263_v11 }
 0x84a   : > { %v1265_v13 = vadd.f32 -0.28449672, %v1264_v12 }
 0x84c   : > { %v1266_v14 = vmul.f32 %v1941_v9, %v1265_v13 }
 0x84e   : > { %v1267_v15 = vadd.f32 0.2548296, %v1266_v14 }
 0x850   : > { %v1268_v16 = vmul.f32 %v1941_v9, %v1267_v15 }
 0x852   : > { %v1273_v18 = vmul.f32 %v1943_v17, %v1268_v16 }
 0x854   : > { %v1274_v19 = vsub.f32 1.0, %v1273_v18 }
 0x856   : > { %v1276_v20 = vsub.f32 0.0, %v1274_v19 }
 0x858   : > { %v1277_v21 = vsel %vm1275_vm7, %v1274_v19, %v1276_v20 }
 0x859   : > { %v1278_v23 = vadd.f32 1.0, %v1277_v21 }
 0x85b   : > { %v1279_v24 = vmul.f32 %v1278_v23, %v1253_v22 }
 0x85d   : > { %v1280_v25 = vpack.c.bf16 %v1279_v24, %v1279_v24 }
 0x85f   : > { %1820 = vmatmul.mubr.bf16.vlgmr.msra.gmra.mxu1 %v1280_v25 }
 0x91f   : > { %v1363_v27 = vpop.f32.mrf.mxu1 }
 0x920   : > { %v1369_v28 = vadd.f32 %v1363_v27, %v2374_v29 }
 0x921   : > { %v1821_v30 = vpop.f32.mrf.mxu1  ;;  %1381 = sbr.rel (%p1715_p6) target bundleno = 3011 (0xbc3), region = 92 }
 0x922   : > { %v1376_v31 = vadd.f32 %v1714_v26, %v1369_v28 }
 0x923   : > { %v1366_v32 = vpop.f32.mrf.mxu1 }
 0x924   : > { %1377 = vst.msk [vmem:[#allocation2] sm:$0xff] %vm772_vm1, %v1376_v31 }
 0x925   : > { %v1822_v33 = vpop.f32.mrf.mxu1 }
 0x926   : > { %vm1391_vm8 = vcmask 253952   ;;  %v1944_v39 = vld [vmem:[%s2560_s25 + $0x8] sm:$0xff]   ;;  %v2068_v40 = vmov 0.0   ;;  %vm2069_vm9 = vmmov 0   ;;  %v1945_v41 = vld [vmem:[%s2560_s25] sm:$0xff]  }
 0x927   : > { %1823 = vmatprep.subr.bf16.mxu0 %v2068_v40  ;;  %1827 = vmatprep.mubr.msk.bf16.mxu0 %vm2069_vm9, %v2068_v40  ;;  %v1385_v46 = vld [vmem:[%s2561_s27] sm:$0x1] }
 0x928   : > { %1824 = vmatpush3.bf16.msra.mxu0 %v1944_v39  ;;  %v1386_v48 = vld [vmem:[%s2562_s20] sm:$0x1] }
 0x929   : > { %1825 = vmatprep.subr.bf16.mxu0 %v2068_v40 }
 0x92b   : > { %v1384_v34 = vld [vmem:[%s1383_s3] sm:$0x1] }
 0x92c   : > { %v1392_v35 = vsel %vm1391_vm8, %v1384_v34, 0.0  ;;  %1826 = vmatpush3.bf16.msra.mxu0 %v1945_v41 }
 0x92d   : > { %1393 = vadd.xlane.f32.xlu0 %v1392_v35 }
 0x9b6   : > { %v1394_v36 = vpop.xlane.xlu0 %1393 }
 0x9b7   : > { %v1395_v37 = vmul.f32 0.03125, %v1394_v36 }
 0x9b9   : > { %v1396_v29 = vsub.f32 %v1384_v34, %v1395_v37 }
 0x9bb   : > { %v1397_v1 = vmul.f32 %v1396_v29, %v1396_v29 }
 0x9bd   : > { %v1398_v38 = vsel %vm1391_vm8, %v1397_v1, 0.0 }
 0x9be   : > { %1399 = vadd.xlane.f32.xlu0 %v1398_v38 }
 0xa47   : > { %v1400_v42 = vpop.xlane.xlu0 %1399 }
 0xa48   : > { %v1401_v43 = vmul.f32 0.03125, %v1400_v42 }
 0xa4a   : > { %v1402_v44 = vadd.f32 1e-05, %v1401_v43 }
 0xa4c   : > { %1946 = vrsqrt.f32 %v1402_v44 }
 0xa59   : > { %v1947_v45 = vpop.eup %1946 }
 0xa5a   : > { %v1404_v47 = vmul.f32 %v1947_v45, %v1396_v29 }
 0xa5c   : > { %v1405_v49 = vmul.f32 %v1404_v47, %v1385_v46 }
 0xa5e   : > { %v1406_v50 = vadd.f32 %v1405_v49, %v1386_v48 }
 0xa60   : > { %v1407_v51 = vpack.c.bf16 %v1406_v50, %v1406_v50 }
 0xa62   : > { %1828 = vmatmul.mubr.msk.bf16.vlgmr.msra.gmra.mxu0 %vm772_vm1, %v1407_v51 }
 0xb22   : > { %v1457_v52 = vpop.f32.mrf.mxu0 }
 0xb23   : > { %v1463_v53 = vmul.f32 %v1457_v52, %v1457_v52 }
 0xb24   : > { %v1829_v54 = vpop.f32.mrf.mxu0 }
 0xb25   : > { %v1464_v55 = vsel %vm1391_vm8, %v1463_v53, 0.0 }
 0xb26   : > { %1465 = vadd.xlane.f32.xlu1 %v1464_v55  ;;  %v1460_v56 = vpop.f32.mrf.mxu0 }
 0xb28   : > { %v1830_v57 = vpop.f32.mrf.mxu0 }
 0xbaf   : > { %v1466_v58 = vpop.xlane.xlu1 %1465 }
 0xbb0   : > { %v1467_v59 = vadd.f32 1e-12, %v1466_v58 }
 0xbb2   : > { %1948 = vrsqrt.f32 %v1467_v59 }
 0xbbf   : > { %v1949_v60 = vpop.eup %1948 }
 0xbc0   : > { %v1469_v61 = vmul.f32 %v1949_v60, %v1457_v52 }
 0xbc2   : > { %1470 = vst.msk [vmem:[%s2299_s15] sm:$0x1] %vm1391_vm8, %v1469_v61 }
 0xbc3 PF: > { %s2563_s30 = sld [smem:[#allocation11_spill]]  ;;  %s1484_s11 = sshll.u32 %s2299_s15, 4  ;;  %s1485_s11 = int_to_ptr.vmem [resolvable:$true] %s1484_s11 }
 0xbc4   : > { %s2565_s6 = sld [smem:[#allocation30_spill]]  ;;  %s2566_s14 = sand.u32 1, %s2032_s0  }
 0xbc5   : > { %s1472_s3 = scalar_lea.sflag [#allocation6], %s2566_s14  ;;  %s1962_s1 = scalar_lea.vmem %s1485_s11, 16 }
 0xbc6   : > { %p1963_p7 = scmp.ne.s32.totalorder %s1485_s11, %s1962_s1  ;;  %s2070_s29 = smov [#allocation5]  }
 0xbc7   : > { %s1966_s18 = sshll.u32 %s2070_s29, 4  ;;  %s1967_s18 = int_to_ptr.vmem [resolvable:$false] %s1966_s18 }
 0xbc8   : > { %p1964_p9 = pnand %p1963_p7, %p2213_p8  ;;  %s1968_s16 = scalar_lea.vmem %s1967_s18, 32 }
 0xbc9   : > { %s1719_s4 = sshll.u32 %s2563_s30, 4  ;;  %p1969_p11 = scmp.lt.s32.totalorder %s1485_s11, %s1967_s18 }
 0xbca   : > { %s1482_s26 = scalar_lea.hbm %s2565_s6, %s1719_s4  ;;  %p1965_p10 = pneg %p1964_p9 }
 0xbcb   : > { %p1970_p12 = scmp.lt.s32.totalorder %s1968_s16, %s1962_s1 }
 0xbcd   : > { %p1971_p13 = por %p1970_p12, %p1969_p11 }
 0xbcf   : > { %p1972_p1 = pnand %p1971_p13, %p1965_p10 }
 0xbd1   : > { %1975 = shalt.err (!%p1972_p1)
}
 0xbd2   : > { %s1976_s22 = scalar_lea.hbm %s1482_s26, 16  ;;  %s1980_s27 = scalar_lea.hbm %s2565_s6, 32 }
 0xbd3   : > { %p1977_p2 = scmp.ne.s32.totalorder %s1482_s26, %s1976_s22  ;;  %p1981_p5 = scmp.lt.s32.totalorder %s1482_s26, %s2565_s6 }
 0xbd4   : > { %p1982_p6 = scmp.lt.s32.totalorder %s1980_s27, %s1976_s22 }
 0xbd5   : > { %p1978_p3 = pnand %p1977_p2, %p2213_p8 }
 0xbd6   : > { %p1983_p7 = por %p1982_p6, %p1981_p5 }
 0xbd7   : > { %p1979_p4 = pneg %p1978_p3 }
 0xbd9   : > { %p1984_p9 = pnand %p1983_p7, %p1979_p4 }
 0xbdb   : > { %1987 = shalt.err (!%p1984_p9)
}
 0xbdc   : > { %1831 = dma.vmem_to_hbm [thread:$0]  (%p2213_p8), %s1485_s11, 16, %s1482_s26, %s1472_s3  }
 0xbdd PF: > { %s2567_s20 = sld [smem:[#allocation14_spill]] }
 0xbde   : > { %s2568_s30 = sld [smem:[#allocation9_spill]] }
 0xbe3   : > { %p1837_p10 = scmp.ge.s32.totalorder %s2567_s20, 2 }
 0xbe4   : > { %s1496_s23 = sand.u32 1, %s2568_s30  }
 0xbe5   : > { %p1834_p11 = pnand %p1837_p10, %p2223_p0  ;;  %s1497_s17 = scalar_lea.sflag [#allocation6], %s1496_s23 }
 0xbe7   : > { %p1835_p12 = pneg %p1834_p11 }
 0xbe9   : > { %2023 = dma.done.wait (%p1835_p12), %s1497_s17, 16  }
 0xbea   : > { %2025 = vsyncadd (%p1835_p12), %s1497_s17, 4294967280  ;;  %s36_s11 = sadd.s32 1, %s2567_s20   ;;  %s2570_s14 = sld [smem:[#allocation10_spill]] }
 0xbeb   : > { %p33_p13 = scmp.ge.s32.totalorder %s36_s11, 6   ;;  %s2571_s30 = sld [smem:[#allocation19_spill]] }
 0xbec   : > { %s2572_s18 = sld [smem:[#allocation12_spill]]  ;;  %s2576_s29 = smov %s2032_s0 }
 0xbed   : > { %s2573_s19 = sld [smem:[#allocation13_spill]]  ;;  %35 = sbr.rel (!%p33_p13) target bundleno = 36 (0x24), region = 164 }
 0xbee   : > { %s2574_s1 = sld [smem:[#allocation15_spill]] }
 0xbef   : > { %s2575_s20 = sld [smem:[#allocation17_spill]] }
 0xbf0   : > { %s2577_s0 = smov %s2570_s14 }
 0xbf2   :  { %1501 = vsyncpa [#allocation6], 1 }
 0xbf3   :  { %1503 = vsyncpa [#allocation6 + $0x1], 1 }

// kernel: clip_forward.2
= control target key start
LH: loop header
LB: loop body
LE: loop exit
PB: predicated region body
PF: predicated region fallthrough
CT: control target
= control target key end

     0   :  { %s2837_s0 = inlined_call_operand.vmem [shape: f32[2,5,192], index: 0, kind: input, shape index: {}]   ;;  %s2838_s1 = inlined_call_operand.vmem [shape: bf16[192,32], index: 1, kind: input, shape index: {}]   ;;  %s2839_s2 = inlined_call_operand.vmem [shape: f32[5,32], index: 2, kind: input, shape index: {}]   ;;  %s2840_s3 = inlined_call_operand.vmem [shape: f32[1,32], index: 3, kind: input, shape index: {}]   ;;  %s2841_s4 = inlined_call_operand.vmem [shape: f32[1,32], index: 4, kind: input, shape index: {}]   ;;  %s2842_s5 = inlined_call_operand.vmem [shape: f32[2,1,32], index: 5, kind: input, shape index: {}]   ;;  %s2843_s6 = inlined_call_operand.vmem [shape: f32[2,1,32], index: 6, kind: input, shape index: {}]   ;;  %s2844_s7 = inlined_call_operand.vmem [shape: bf16[2,32,96], index: 7, kind: input, shape index: {}]   ;;  %s2845_s8 = inlined_call_operand.vmem [shape: f32[2,1,96], index: 8, kind: input, shape index: {}]   ;;  %s2846_s9 = inlined_call_operand.vmem [shape: bf16[2,32,32], index: 9, kind: input, shape index: {}]   ;;  %s2847_s10 = inlined_call_operand.vmem [shape: f32[2,1,32], index: 10, kind: input, shape index: {}]   ;;  %s2848_s11 = inlined_call_operand.vmem [shape: f32[2,1,32], index: 11, kind: input, shape index: {}]   ;;  %s2849_s12 = inlined_call_operand.vmem [shape: f32[2,1,32], index: 12, kind: input, shape index: {}]   ;;  %s2850_s13 = inlined_call_operand.vmem [shape: bf16[2,32,128], index: 13, kind: input, shape index: {}]   ;;  %s2851_s14 = inlined_call_operand.vmem [shape: f32[2,1,128], index: 14, kind: input, shape index: {}]   ;;  %s2852_s15 = inlined_call_operand.vmem [shape: bf16[2,128,32], index: 15, kind: input, shape index: {}]   ;;  %s2853_s16 = inlined_call_operand.vmem [shape: f32[2,1,32], index: 16, kind: input, shape index: {}]   ;;  %s2854_s17 = inlined_call_operand.vmem [shape: f32[1,32], index: 17, kind: input, shape index: {}]   ;;  %s2855_s18 = inlined_call_operand.vmem [shape: f32[1,32], index: 18, kind: input, shape index: {}]   ;;  %s2856_s19 = inlined_call_operand.vmem [shape: bf16[32,32], index: 19, kind: input, shape index: {}]   ;;  %s2857_s20 = inlined_call_operand.hbm [shape: f32[2,1,32], index: 20, kind: output, shape index: {}]  }
   0x1   :  { %2873 = sst [smem:[#allocation18_spill]] %s2837_s0 }
   0x2   :  { %2874 = sst [smem:[#allocation19_spill]] %s2838_s1 }
   0x3   :  { %2875 = sst [smem:[#allocation20_spill]] %s2839_s2 }
   0x4   :  { %2876 = sst [smem:[#allocation21_spill]] %s2840_s3 }
   0x5   :  { %2877 = sst [smem:[#allocation22_spill]] %s2841_s4 }
   0x6   :  { %2878 = sst [smem:[#allocation23_spill]] %s2843_s6 }
   0x7   :  { %2879 = sst [smem:[#allocation24_spill]] %s2844_s7 }
   0x8   :  { %2880 = sst [smem:[#allocation25_spill]] %s2846_s9 }
   0x9   :  { %2881 = sst [smem:[#allocation26_spill]] %s2854_s17 }
   0xa   :  { %2882 = sst [smem:[#allocation27_spill]] %s2855_s18 }
   0xb   :  { %2883 = sst [smem:[#allocation28_spill]] %s2856_s19 }
   0xc   :  { %2884 = sst [smem:[#allocation29_spill]] %s2857_s20 }
   0xd   :  { %25 = vsyncpa [#allocation4], 0 }
   0xe   :  { %27 = vsyncpa [#allocation4 + $0x1], 0  ;;  %s2466_s1 = smov 0   ;;  %s2468_s22 = smov 0  }
   0xf   :  { %s2470_s23 = smov 0   ;;  %s2472_s24 = smov 0  }
  0x10   :  { %s2474_s2 = smov 0   ;;  %s2476_s25 = smov 0  }
  0x11   :  { %s2478_s3 = smov 0   ;;  %s2480_s26 = smov 0  }
  0x12 LB: > { %2885 = sst [smem:[#allocation6_spill]] %s2318_s1  ;;  %s1944_s27 = sadd.s32 4294967295, %s2346_s26   ;;  %s2346_s26 = sphi %s2480_s26, %s33_s26   ;;  %s2342_s3 = sphi %s2478_s3, %s2933_s3   ;;  %s2338_s25 = sphi %s2476_s25, %s2932_s25   ;;  %s2334_s2 = sphi %s2474_s2, %s2931_s2   ;;  %s2330_s24 = sphi %s2472_s24, %s2930_s24   ;;  %s2326_s23 = sphi %s2470_s23, %s2929_s23   ;;  %s2322_s22 = sphi %s2468_s22, %s2935_s22   ;;  %s2318_s1 = sphi %s2466_s1, %s2934_s1  }
  0x13   : > { %2886 = sst [smem:[#allocation7_spill]] %s2326_s23  ;;  %s1945_s28 = sadd.s32 4294967294, %s2346_s26  }
  0x14   : > { %2887 = sst [smem:[#allocation8_spill]] %s2330_s24  ;;  %s42_s4 = sadd.s32 1, %s2338_s25 }
  0x15   : > { %2888 = sst [smem:[#allocation9_spill]] %s2334_s2  ;;  %p43_p0 = scmp.ge.s32.totalorder %s42_s4, 2 }
  0x16   : > { %2889 = sst [smem:[#allocation10_spill]] %s2338_s25  ;;  %s45_s29 = sadd.s32 1, %s2342_s3 }
  0x17   : > { %2890 = sst [smem:[#allocation11_spill]] %s2342_s3  ;;  %p547_p1 = scmp.ne.s32.totalorder %s2326_s23, %s2322_s22 }
  0x18   : > { %2891 = sst [smem:[#allocation12_spill]] %s2346_s26  ;;  %p548_p2 = scmp.eq.s32.totalorder %s1944_s27, 3 }
  0x19   : > { %s2937_s4 = smov (%p43_p0, %s42_s4), 0  ;;  %s2939_s29 = smov (!%p43_p0, %s45_s29), %s2342_s3 }
  0x1a   : > { %2892 = sst [smem:[#allocation13_spill]] %s2937_s4  ;;  %p2515_p3 = por %p548_p2, %p547_p1 }
  0x1b   : > { %p553_p4 = scmp.ne.s32.totalorder %s2322_s22, %s2318_s1  ;;  %p47_p5 = scmp.ge.s32.totalorder %s2939_s29, 2 }
  0x1c   : > { %s2893_s30 = scalar_select %p2515_p3, 1, 0 }
  0x1d   : > { %p554_p6 = scmp.eq.s32.totalorder %s1945_s28, 3  ;;  %p1948_p7 = scmp.ge.s32.totalorder %s2346_s26, 1 }
  0x1e   : > { %2894 = sst [smem:[#allocation14_spill]] %s2893_s30  ;;  %p681_p8 = scmp.lt.s32.totalorder %s2346_s26, 5 }
  0x1f   : > { %s2941_s29 = smov (%p47_p5, %s2939_s29), 0  ;;  %p2525_p9 = por %p554_p6, %p553_p4 }
  0x20   : > { %2895 = sst [smem:[#allocation15_spill]] %s2941_s29  ;;  %p682_p10 = pnand %p1948_p7, %p681_p8 }
  0x21   : > { %s2896_s0 = scalar_select %p2525_p9, 1, 0 }
  0x22   : > { %s534_s21 = ssub.s32 %s2342_s3, %s2941_s29  ;;  %s537_s27 = sadd.s32 1, %s2326_s23 }
  0x23   : > { %2897 = sst [smem:[#allocation16_spill]] %s2896_s0  ;;  %p535_p11 = scmp.eq.s32.totalorder %s534_s21, 0 }
  0x24   : > { %685 = sbr.rel (%p682_p10) target bundleno = 3567 (0xdef), region = 100  ;;  %p782_p12 = scmp.lt.s32.totalorder (!%p682_p10), %s2334_s2, 1 }
  0x25   : > { %s2533_s4 = scalar_select %p535_p11, %s2326_s23, %s537_s27  }
  0x26   : > { %p787_p13 = scmp.lt.s32.totalorder (!%p682_p10), %s2330_s24, 1  ;;  %s2899_s3 = sld [smem:[#allocation18_spill]] (!%p682_p10) }
  0x27   : > { %2898 = sst [smem:[#allocation17_spill]] %s2533_s4  ;;  %s2903_s17 = sand.u32 (!%p682_p10), 1, %s2322_s22  }
  0x28   : > { %s2901_s7 = sld [smem:[#allocation24_spill]] (!%p682_p10)  ;;  %s2603_s18 = scalar_lea.vmem (!%p682_p10), [#allocation3], %s2903_s17 }
  0x29   : > { %s783_s25 = scalar_select %p782_p12, %s2334_s2, 1 }
  0x2a   : > { %s2540_s1 = scalar_select %p787_p13, %s2330_s24, 1 }
  0x2b   : > { %s2011_s21 = sshll.u32 %s783_s25, 4  ;;  %s2902_s9 = sld [smem:[#allocation25_spill]] }
  0x2c   : > { %s2545_s28 = scalar_lea.vmem %s2899_s3, %s2011_s21  ;;  %s2012_s2 = sshll.u32 %s2540_s1, 4 }
  0x2d   : > { %s2585_s25 = scalar_lea.vmem %s2850_s13, %s2012_s2  ;;  %s822_s29 = scalar_lea.vmem %s2851_s14, %s2540_s1 }
  0x2e   : > { %s2559_s19 = scalar_lea.vmem %s2901_s7, %s2012_s2  ;;  %s814_s7 = scalar_lea.vmem %s2849_s12, %s2540_s1 }
  0x2f   : > { %s830_s20 = scalar_lea.vmem %s2853_s16, %s2540_s1  ;;  %s2904_s6 = sld [smem:[#allocation8_spill]] }
  0x31   : > { %s2568_s27 = scalar_lea.vmem %s2902_s9, %s2012_s2  ;;  %s2015_s9 = sshll.u32 %s2540_s1, 6 }
  0x32   : > { %s2599_s0 = scalar_lea.vmem %s2852_s15, %s2015_s9 }
  0x35   : > { %p1959_p0 = scmp.ne.s32.totalorder %s2904_s6, 0 }
  0x36   : > { %s2905_s3 = sld [smem:[#allocation19_spill]] (!%p1959_p0) }
  0x37   : > { %835 = sbr.rel (%p1959_p0) target bundleno = 613 (0x265), region = 104  ;;  %s2907_s26 = sld [smem:[#allocation20_spill]] (!%p1959_p0) }
  0x38   : > { %s2908_s6 = sld [smem:[#allocation21_spill]] (!%p1959_p0) }
  0x3c   : > { %s2906_s21 = smov %s2905_s3  ;;  %v2204_v0 = vld [vmem:[%s2905_s3 + $0x38] sm:$0xff]   ;;  %v2348_v1 = vmov 0   ;;  %v837_v5 = vld [vmem:[%s2545_s28 + $0x8] sm:$0x1f]  ;;  %vm937_vm0 = vcmask 523264   ;;  %vm983_vm1 = vcmask 258048  }
  0x3d   : > { %941 = vmatprep.subr.bf16.mxu0 %v2348_v1  ;;  %v2205_v2 = vld [vmem:[%s2906_s21 + $0x30] sm:$0xff]   ;;  %v2206_v3 = vld [vmem:[%s2906_s21 + $0x28] sm:$0xff]   ;;  %v2207_v4 = vld [vmem:[%s2906_s21 + $0x20] sm:$0xff]   ;;  %v863_v6 = vpack.c.bf16 %v837_v5, %v837_v5  ;;  %s2909_s3 = sld [smem:[#allocation22_spill]] }
  0x3e   : > { %942 = vmatpush1.bf16.msra.mxu0 %v2204_v0  ;;  %v2208_v7 = vld [vmem:[%s2906_s21 + $0x18] sm:$0xff]   ;;  %v2209_v8 = vld [vmem:[%s2906_s21 + $0x10] sm:$0xff]   ;;  %v2210_v9 = vld [vmem:[%s2906_s21 + $0x8] sm:$0xff]  }
  0x3f   : > { %943 = vmatprep.subr.bf16.mxu0 %v2348_v1  ;;  %1972 = vmatprep.mubr.msk.bf16.mxu0 %vm937_vm0, %v863_v6  ;;  %v2211_v10 = vld [vmem:[%s2906_s21] sm:$0xff]   ;;  %v2212_v11 = vld [vmem:[%s2906_s21 + $0x58] sm:$0xff]   ;;  %v2213_v12 = vld [vmem:[%s2906_s21 + $0x50] sm:$0xff]  }
  0x40   : > { %v2214_v13 = vld [vmem:[%s2906_s21 + $0x48] sm:$0xff]   ;;  %v2215_v14 = vld [vmem:[%s2906_s21 + $0x40] sm:$0xff]  }
  0x41   : > { %v836_v15 = vld [vmem:[%s2545_s28] sm:$0x1f] }
  0x42   : > { %944 = vmatpush1.bf16.msra.mxu0 %v2205_v2  ;;  %v862_v16 = vpack.c.bf16 %v836_v15, %v836_v15  ;;  %v864_v17 = vld [vmem:[%s2907_s26] sm:$0x1f] }
  0x43   : > { %945 = vmatprep.subr.bf16.mxu0 %v2348_v1  ;;  %v1973_v33 = vld [vmem:[%s2908_s6] ss:$0 sm:$0xff] }
  0x44   : > { %v1974_v35 = vld [vmem:[%s2909_s3] ss:$0 sm:$0xff] }
  0x46   : > { %946 = vmatpush1.bf16.msra.mxu0 %v2206_v3 }
  0x47   : > { %947 = vmatprep.subr.bf16.mxu0 %v2348_v1 }
  0x4a   : > { %948 = vmatpush1.bf16.msra.mxu0 %v2207_v4 }
  0x4b   : > { %949 = vmatprep.subr.bf16.mxu0 %v2348_v1 }
  0x4e   : > { %950 = vmatpush1.bf16.msra.mxu0 %v2208_v7 }
  0x4f   : > { %951 = vmatprep.subr.bf16.mxu0 %v2348_v1 }
  0x52   : > { %952 = vmatpush1.bf16.msra.mxu0 %v2209_v8 }
  0x53   : > { %953 = vmatprep.subr.bf16.mxu0 %v2348_v1 }
  0x56   : > { %954 = vmatpush1.bf16.msra.mxu0 %v2210_v9 }
  0x57   : > { %955 = vmatprep.subr.bf16.mxu0 %v2348_v1 }
  0x5a   : > { %956 = vmatpush1.bf16.msra.mxu0 %v2211_v10 }
  0x5b   : > { %965 = vmatprep.subr.bf16.mxu0 %v2348_v1 }
  0x5e   : > { %966 = vmatpush2.bf16.msra.mxu0 %v2212_v11 }
  0x5f   : > { %967 = vmatprep.subr.bf16.mxu0 %v2348_v1 }
  0x62   : > { %968 = vmatpush2.bf16.msra.mxu0 %v2213_v12 }
  0x63   : > { %969 = vmatprep.subr.bf16.mxu0 %v2348_v1 }
  0x66   : > { %970 = vmatpush2.bf16.msra.mxu0 %v2214_v13 }
  0x67   : > { %971 = vmatprep.subr.bf16.mxu0 %v2348_v1 }
  0x6a   : > { %972 = vmatpush2.bf16.msra.mxu0 %v2215_v14 }
  0x6d   : > { %974 = vmatmul.mubr.bf16.vlgmr.msra.gmra.mxu0 %v862_v16 }
 0x12d   : > { %v975_v18 = vpop.f32.mrf.mxu0 }
 0x12e   : > { %v976_v19 = vadd.f32 %v975_v18, %v864_v17 }
 0x12f   : > { %v977_v20 = vpop.f32.mrf.mxu0 }
 0x130   : > { %v984_v21 = vsel %vm983_vm1, %v976_v19, 0.0 }
 0x131   : > { %v978_v22 = vpop.f32.mrf.mxu0  ;;  %985 = vadd.xlane.f32.xlu0 %v984_v21 }
 0x133   : > { %v979_v23 = vpop.f32.mrf.mxu0 }
 0x1ba   : > { %v986_v24 = vpop.xlane.xlu0 %985 }
 0x1bb   : > { %v988_v25 = vmul.f32 0.03125, %v986_v24 }
 0x1bd   : > { %v989_v26 = vsub.f32 %v976_v19, %v988_v25 }
 0x1bf   : > { %v990_v27 = vmul.f32 %v989_v26, %v989_v26 }
 0x1c1   : > { %v991_v28 = vsel %vm983_vm1, %v990_v27, 0.0 }
 0x1c2   : > { %992 = vadd.xlane.f32.xlu0 %v991_v28 }
 0x24b   : > { %v993_v29 = vpop.xlane.xlu0 %992 }
 0x24c   : > { %v994_v30 = vmul.f32 0.03125, %v993_v29 }
 0x24e   : > { %v995_v31 = vadd.f32 1e-05, %v994_v30 }
 0x250   : > { %2216 = vrsqrt.f32 %v995_v31 }
 0x25d   : > { %v2217_v32 = vpop.eup %2216 }
 0x25e   : > { %v997_v34 = vmul.f32 %v2217_v32, %v989_v26 }
 0x260   : > { %v1004_v36 = vmul.f32 %v1973_v33, %v997_v34 }
 0x262   : > { %v1011_v37 = vadd.f32 %v1974_v35, %v1004_v36 }
 0x264   : > { %1012 = vst.msk [vmem:[#allocation2] sm:$0x1f] %vm983_vm1, %v1011_v37 }
 0x265 PF: > { %vm1050_vm2 = vcmask 258048   ;;  %v2218_v45 = vld [vmem:[%s2559_s19 + $0x8] sm:$0xff]   ;;  %v2349_v46 = vmov 0.0   ;;  %vm2350_vm3 = vmmov 0   ;;  %v2219_v47 = vld [vmem:[%s2559_s19] sm:$0xff]   ;;  %s2910_s19 = scalar_lea.vmem %s2842_s5, %s2540_s1  ;;  %s2911_s26 = sld [smem:[#allocation23_spill]] }
 0x266   : > { %2045 = vmatprep.subr.bf16.mxu0 %v2349_v46  ;;  %2049 = vmatprep.mubr.msk.bf16.mxu0 %vm2350_vm3, %v2349_v46  ;;  %v1975_v52 = vld [vmem:[%s2910_s19] ss:$0 sm:$0xff]  ;;  %vm1098_vm4 = vcmask 261120   ;;  %s2913_s2 = scalar_lea.vmem %s2845_s8, %s2540_s1  ;;  %s2351_s24 = smov 96   ;;  %vm1148_vm5 = vcmask 130048   ;;  %vm1195_vm6 = vcmask 36864  }
 0x267   : > { %2046 = vmatpush3.bf16.msra.mxu0 %v2218_v45  ;;  %2065 = vmatprep.subr.bf16.mxu1 %v2349_v46  ;;  %v1977_v58 = vld [vmem:[%s2913_s2] ss:$0 sm:$0xff]  ;;  %s2352_s3 = smov 112   ;;  %s2353_s23 = smov 80   ;;  %vm1213_vm7 = vcmask 1041408   ;;  %vm1214_vm8 = vcmask 1042432  }
 0x268   : > { %2047 = vmatprep.subr.bf16.mxu0 %v2349_v46  ;;  %2067 = vmatprep.mubr.msk.bf16.mxu1 %vm2350_vm3, %v2349_v46  ;;  %s2354_s4 = smov 64   ;;  %s2355_s19 = smov 48   ;;  %v2356_v18 = vmov 65535   ;;  %vm1209_vm9 = vcmask 39936   ;;  %v2220_v37 = vld [vmem:[%s2568_s27 + $0x8] sm:$0xff]  }
 0x269   : > { %v1215_v19 = vsel %vm1213_vm7, 4294967295, %v2356_v18  ;;  %s2357_s9 = smov 16   ;;  %s2915_s6 = scalar_lea.vmem %s2848_s11, %s2540_s1  ;;  %v2224_v18 = vld [vmem:[%s2599_s0 + $0x38] sm:$0xff]  }
 0x26a   : > { %v1216_v22 = vsel %vm1214_vm8, %v1215_v19, 0  ;;  %v2225_v19 = vld [vmem:[%s2599_s0 + $0x30] sm:$0xff]  }
 0x26b   : > { %v2656_v38 = vld [vmem:[#allocation2] sm:$0x1f]  ;;  %2048 = vmatpush3.bf16.msra.mxu0 %v2219_v47  ;;  %s2912_s28 = scalar_lea.vmem %s2911_s26, %s2540_s1  ;;  %s2914_s26 = scalar_lea.vmem %s2847_s10, %s2540_s1 }
 0x26c   : > { %v1051_v39 = vsel %vm1050_vm2, %v2656_v38, 0.0  ;;  %2053 = vmatprep.subr.bf16.mxu0 %v2349_v46  ;;  %v1976_v54 = vld [vmem:[%s2912_s28] ss:$0 sm:$0xff] }
 0x26d   : > { %1052 = vadd.xlane.f32.xlu0 %v1051_v39 }
 0x2f6   : > { %v1053_v40 = vpop.xlane.xlu0 %1052 }
 0x2f7   : > { %v1055_v41 = vmul.f32 0.03125, %v1053_v40  ;;  %v2221_v40 = vld [vmem:[%s2568_s27] sm:$0xff]  }
 0x2f9   : > { %v1056_v42 = vsub.f32 %v2656_v38, %v1055_v41 }
 0x2fb   : > { %v1057_v43 = vmul.f32 %v1056_v42, %v1056_v42 }
 0x2fd   : > { %v1058_v44 = vsel %vm1050_vm2, %v1057_v43, 0.0 }
 0x2fe   : > { %1059 = vadd.xlane.f32.xlu0 %v1058_v44 }
 0x387   : > { %v1060_v48 = vpop.xlane.xlu0 %1059 }
 0x388   : > { %v1061_v49 = vmul.f32 0.03125, %v1060_v48 }
 0x38a   : > { %v1062_v50 = vadd.f32 1e-05, %v1061_v49 }
 0x38c   : > { %2232 = vrsqrt.f32 %v1062_v50 }
 0x399   : > { %v2233_v51 = vpop.eup %2232 }
 0x39a   : > { %v1064_v53 = vmul.f32 %v2233_v51, %v1056_v42 }
 0x39c   : > { %v1071_v55 = vmul.f32 %v1975_v52, %v1064_v53 }
 0x39e   : > { %v1078_v56 = vadd.f32 %v1976_v54, %v1071_v55 }
 0x3a0   : > { %v1079_v57 = vpack.c.bf16 %v1078_v56, %v1078_v56 }
 0x3a2   : > { %2050 = vmatmul.mubr.msk.bf16.vlgmr.msra.gmra.mxu0 %vm1098_vm4, %v1079_v57 }
 0x3a3   : > { %2055 = vmatprep.mubr.msk.bf16.mxu0 %vm2350_vm3, %v2349_v46 }
 0x462   : > { %v1136_v59 = vpop.f32.mrf.mxu0 }
 0x463   : > { %v1137_v60 = vadd.f32 %v1977_v58, %v1136_v59  ;;  %v1988_v58 = vld [vmem:[%s2914_s26] ss:$0 sm:$0xff] }
 0x464   : > { %v2051_v61 = vpop.f32.mrf.mxu0 }
 0x465   : > { %v1142_v62 = vmul.f32 0.25, %v1137_v60  ;;  %v1144_v63 = vpack.c.bf16 %v1137_v60, %v1137_v60 }
 0x466   : > { %v1139_v0 = vpop.f32.mrf.mxu0 }
 0x467   : > { %v1143_v1 = vpack.c.bf16 %v1142_v62, %v1142_v62  ;;  %1146 = vrot.lane.b32.xlu1 %v1144_v63, %s2351_s24 }
 0x468   : > { %v2052_v2 = vpop.f32.mrf.mxu0 }
 0x469   : > { %1262 = vrot.lane.b32.xlu0 %v1143_v1, %s2352_s3  ;;  %s2916_s3 = sld [smem:[#allocation8_spill]] }
 0x46b   : > { %1264 = vrot.lane.b32.xlu1 %v1144_v63, %s2353_s23 }
 0x46f   : > { %p2004_p1 = scmp.ne.s32.totalorder %s2916_s3, 1 }
 0x470   : > { %s2917_s23 = sld [smem:[#allocation28_spill]] (!%p2004_p1) }
 0x471   : > { %s2919_s26 = sld [smem:[#allocation26_spill]] (!%p2004_p1) }
 0x4d9   : > { %v1147_v3 = vpop.permute.xlu1 %1146 }
 0x4da   : > { %v1153_v4 = vsel %vm1148_vm5, %v1147_v3, 0 }
 0x4db   : > { %2054 = vmatpush3.bf16.xpose.msra.mxu0 %v1153_v4  ;;  %v1263_v7 = vpop.permute.xlu0 %1262 }
 0x4dc   : > { %2059 = vmatprep.subr.bf16.mxu0 %v2349_v46 }
 0x4dd   : > { %v1265_v5 = vpop.permute.xlu1 %1264 }
 0x4de   : > { %v1270_v6 = vsel %vm1148_vm5, %v1265_v5, 0 }
 0x4df   : > { %2066 = vmatpush3.bf16.xpose.msra.mxu1 %v1270_v6 }
 0x4e0   : > { %2077 = vmatprep.subr.bf16.mxu1 %v2349_v46 }
 0x4e2   : > { %2056 = vmatmul.mubr.msk.bf16.vlgmr.msra.gmra.mxu0 %vm1148_vm5, %v1143_v1 }
 0x4e3   : > { %2061 = vmatprep.mubr.msk.bf16.mxu0 %vm2350_vm3, %v2349_v46 }
 0x4e6   : > { %2068 = vmatmul.mubr.msk.bf16.vlgmr.msra.gmra.mxu1 %vm1148_vm5, %v1263_v7  ;;  %v2223_v7 = vld [vmem:[%s2585_s25] sm:$0xff]  }
 0x4e7   : > { %2081 = vmatprep.mubr.msk.bf16.mxu1 %vm2350_vm3, %v2349_v46  ;;  %2078 = vmatpush3.bf16.msra.mxu1 %v2220_v37 }
 0x4e8   : > { %2079 = vmatprep.subr.bf16.mxu1 %v2349_v46 }
 0x4eb   : > { %2080 = vmatpush3.bf16.msra.mxu1 %v2221_v40 }
 0x4ec   : > { %2093 = vmatprep.subr.bf16.mxu1 %v2349_v46 }
 0x5a2   : > { %v1189_v8 = vpop.f32.mrf.mxu0 }
 0x5a3   : > { %v1196_v9 = vsel %vm1195_vm6, %v1189_v8, -inf }
 0x5a4   : > { %1197 = vmax.xlane.f32.xlu1 %v1196_v9  ;;  %v2057_v10 = vpop.f32.mrf.mxu0 }
 0x5a6   : > { %v1192_v11 = vpop.f32.mrf.mxu0  ;;  %v1306_v12 = vpop.f32.mrf.mxu1 }
 0x5a7   : > { %v1312_v13 = vsel %vm1195_vm6, %v1306_v12, -inf }
 0x5a8   : > { %1313 = vmax.xlane.f32.xlu0 %v1312_v13  ;;  %v2058_v14 = vpop.f32.mrf.mxu0  ;;  %v2069_v15 = vpop.f32.mrf.mxu1 }
 0x5a9   : > { %v1990_v14 = vld [vmem:[%s814_s7] ss:$0 sm:$0xff] }
 0x5aa   : > { %v1309_v16 = vpop.f32.mrf.mxu1 }
 0x5ac   : > { %v2070_v17 = vpop.f32.mrf.mxu1 }
 0x5b5   : > { %1207 = vrot.lane.b32.xlu1 %v1144_v63, %s2354_s4  ;;  %s2918_s4 = smov (!%p2004_p1), %s2917_s23 }
 0x5be   : > { %1323 = vrot.lane.b32.xlu0 %v1144_v63, %s2355_s19 }
 0x62d   : > { %v1198_v20 = vpop.xlane.xlu1 %1197 }
 0x62e   : > { %v1199_v21 = vsub.f32 %v1189_v8, %v1198_v20  ;;  %v2226_v20 = vld [vmem:[%s2599_s0 + $0x28] sm:$0xff]  }
 0x630   : > { %v1200_v23 = vmul.f32 1.442695, %v1199_v21  ;;  %v2227_v21 = vld [vmem:[%s2599_s0 + $0x20] sm:$0xff]  }
 0x631   : > { %v1314_v24 = vpop.xlane.xlu0 %1313  ;;  %v1208_v25 = vpop.permute.xlu1 %1207 }
 0x632   : > { %2234 = vpow2.f32 %v1200_v23  ;;  %v1315_v26 = vsub.f32 %v1306_v12, %v1314_v24  ;;  %v1218_v27 = vand.u32 %v1216_v22, %v1208_v25  ;;  %v1989_v12 = vld [vmem:[%s2915_s6] ss:$0 sm:$0xff]  ;;  %v2229_v23 = vld [vmem:[%s2599_s0 + $0x10] sm:$0xff]   ;;  %v2230_v24 = vld [vmem:[%s2599_s0 + $0x8] sm:$0xff]   ;;  %s2920_s6 = sld [smem:[#allocation27_spill]] (!%p2004_p1) }
 0x633   : > { %v2231_v25 = vld [vmem:[%s2599_s0] sm:$0xff]  }
 0x634   : > { %v1316_v28 = vmul.f32 1.442695, %v1315_v26  ;;  %2060 = vmatpush3.bf16.msra.mxu0 %v1218_v27  ;;  %v1991_v26 = vld [vmem:[%s822_s29] ss:$0 sm:$0xff] }
 0x635   : > { %2071 = vmatprep.subr.bf16.mxu0 %v2349_v46  ;;  %v1324_v29 = vpop.permute.xlu0 %1323 }
 0x636   : > { %2236 = vpow2.f32 %v1316_v28  ;;  %v1329_v33 = vand.u32 %v1324_v29, %v1216_v22  ;;  %v2228_v22 = vld [vmem:[%s2599_s0 + $0x18] sm:$0xff]  }
 0x63f   : > { %v2235_v30 = vpop.eup %2234 }
 0x640   : > { %v1202_v31 = vsel %vm1195_vm6, %v2235_v30, 0.0  ;;  %v1206_v32 = vpack.c.bf16 %v2235_v30, %v2235_v30 }
 0x641   : > { %1203 = vadd.xlane.f32.xlu0 %v1202_v31 }
 0x642   : > { %2062 = vmatmul.mubr.msk.bf16.vlgmr.msra.gmra.mxu0 %vm1209_vm9, %v1206_v32 }
 0x643   : > { %v2237_v34 = vpop.eup %2236  ;;  %2072 = vmatpush3.bf16.msra.mxu0 %v1329_v33  ;;  %2073 = vmatprep.mubr.msk.bf16.mxu0 %vm2350_vm3, %v2349_v46 }
 0x644   : > { %v1318_v35 = vsel %vm1195_vm6, %v2237_v34, 0.0  ;;  %2085 = vmatprep.subr.bf16.mxu0 %v2349_v46  ;;  %v1322_v36 = vpack.c.bf16 %v2237_v34, %v2237_v34 }
 0x645   : > { %1319 = vadd.xlane.f32.xlu1 %v1318_v35 }
 0x64a   : > { %2074 = vmatmul.mubr.msk.bf16.vlgmr.msra.gmra.mxu0 %vm1209_vm9, %v1322_v36 }
 0x64b   : > { %2089 = vmatprep.mubr.msk.bf16.mxu0 %vm2350_vm3, %v2349_v46 }
 0x6ca   : > { %v1204_v52 = vpop.xlane.xlu0 %1203 }
 0x6ce   : > { %v1320_v39 = vpop.xlane.xlu1 %1319 }
 0x6cf   : > { %2238 = vrcp.f32 %v1320_v39 }
 0x6d0   : > { %2240 = vrcp.f32 %v1204_v52 }
 0x6dc   : > { %v2239_v45 = vpop.eup %2238 }
 0x6dd   : > { %v2241_v53 = vpop.eup %2240 }
 0x702   : > { %v1254_v41 = vpop.f32.mrf.mxu0 }
 0x703   : > { %v1260_v54 = vmul.f32 %v2241_v53, %v1254_v41 }
 0x704   : > { %v2063_v42 = vpop.f32.mrf.mxu0 }
 0x706   : > { %v1257_v43 = vpop.f32.mrf.mxu0 }
 0x708   : > { %v2064_v44 = vpop.f32.mrf.mxu0 }
 0x70a   : > { %v1365_v47 = vpop.f32.mrf.mxu0 }
 0x70b   : > { %v1371_v48 = vmul.f32 %v2239_v45, %v1365_v47 }
 0x70c   : > { %v2075_v49 = vpop.f32.mrf.mxu0 }
 0x70d   : > { %1373 = vrot.lane.b32.xlu1 %v1371_v48, %s2357_s9 }
 0x70e   : > { %v1368_v50 = vpop.f32.mrf.mxu0 }
 0x710   : > { %v2076_v51 = vpop.f32.mrf.mxu0 }
 0x77f   : > { %v1374_v55 = vpop.permute.xlu1 %1373 }
 0x780   : > { %v1376_v56 = vsel %vm1148_vm5, %v1260_v54, %v1374_v55 }
 0x781   : > { %v1377_v57 = vpack.c.bf16 %v1376_v56, %v1376_v56 }
 0x783   : > { %2082 = vmatmul.mubr.msk.bf16.vlgmr.msra.gmra.mxu1 %vm1098_vm4, %v1377_v57 }
 0x784   : > { %2109 = vmatprep.mubr.msk.bf16.mxu1 %vm2350_vm3, %v2349_v46  ;;  %2094 = vmatpush3.bf16.msra.mxu1 %v2224_v18 }
 0x785   : > { %2095 = vmatprep.subr.bf16.mxu1 %v2349_v46 }
 0x788   : > { %2096 = vmatpush3.bf16.msra.mxu1 %v2225_v19 }
 0x789   : > { %2097 = vmatprep.subr.bf16.mxu1 %v2349_v46 }
 0x78c   : > { %2098 = vmatpush3.bf16.msra.mxu1 %v2226_v20 }
 0x78d   : > { %2099 = vmatprep.subr.bf16.mxu1 %v2349_v46 }
 0x790   : > { %2100 = vmatpush3.bf16.msra.mxu1 %v2227_v21 }
 0x791   : > { %2101 = vmatprep.subr.bf16.mxu1 %v2349_v46 }
 0x794   : > { %2102 = vmatpush3.bf16.msra.mxu1 %v2228_v22 }
 0x795   : > { %2103 = vmatprep.subr.bf16.mxu1 %v2349_v46 }
 0x798   : > { %2104 = vmatpush3.bf16.msra.mxu1 %v2229_v23 }
 0x799   : > { %2105 = vmatprep.subr.bf16.mxu1 %v2349_v46 }
 0x79c   : > { %2106 = vmatpush3.bf16.msra.mxu1 %v2230_v24 }
 0x79d   : > { %2107 = vmatprep.subr.bf16.mxu1 %v2349_v46 }
 0x7a0   : > { %2108 = vmatpush3.bf16.msra.mxu1 %v2231_v25 }
 0x843   : > { %v1427_v59 = vpop.f32.mrf.mxu1 }
 0x844   : > { %v1433_v60 = vadd.f32 %v1427_v59, %v2656_v38  ;;  %v2222_v38 = vld [vmem:[%s2585_s25 + $0x8] sm:$0xff]   ;;  %v2003_v59 = vld [vmem:[%s830_s20] ss:$0 sm:$0xff] }
 0x845   : > { %v2083_v61 = vpop.f32.mrf.mxu1  ;;  %2086 = vmatpush3.bf16.msra.mxu0 %v2222_v38 }
 0x846   : > { %v2724_v62 = vadd.f32 %v1988_v58, %v1433_v60  ;;  %2087 = vmatprep.subr.bf16.mxu0 %v2349_v46 }
 0x847   : > { %v1430_v63 = vpop.f32.mrf.mxu1 }
 0x848   : > { %v1441_v0 = vsel %vm1050_vm2, %v2724_v62, 0.0 }
 0x849   : > { %1442 = vadd.xlane.f32.xlu0 %v1441_v0  ;;  %v2084_v1 = vpop.f32.mrf.mxu1  ;;  %2088 = vmatpush3.bf16.msra.mxu0 %v2223_v7 }
 0x8d2   : > { %v1443_v2 = vpop.xlane.xlu0 %1442 }
 0x8d3   : > { %v1444_v3 = vmul.f32 0.03125, %v1443_v2 }
 0x8d5   : > { %v1445_v4 = vsub.f32 %v2724_v62, %v1444_v3 }
 0x8d7   : > { %v1446_v5 = vmul.f32 %v1445_v4, %v1445_v4 }
 0x8d9   : > { %v1447_v6 = vsel %vm1050_vm2, %v1446_v5, 0.0 }
 0x8da   : > { %1448 = vadd.xlane.f32.xlu1 %v1447_v6 }
 0x963   : > { %v1449_v8 = vpop.xlane.xlu1 %1448 }
 0x964   : > { %v1450_v9 = vmul.f32 0.03125, %v1449_v8 }
 0x966   : > { %v1451_v10 = vadd.f32 1e-05, %v1450_v9 }
 0x968   : > { %2242 = vrsqrt.f32 %v1451_v10 }
 0x975   : > { %v2243_v11 = vpop.eup %2242 }
 0x976   : > { %v1453_v13 = vmul.f32 %v2243_v11, %v1445_v4 }
 0x978   : > { %v1460_v15 = vmul.f32 %v1989_v12, %v1453_v13 }
 0x97a   : > { %v1467_v16 = vadd.f32 %v1990_v14, %v1460_v15 }
 0x97c   : > { %v1468_v17 = vpack.c.bf16 %v1467_v16, %v1467_v16 }
 0x97e   : > { %2090 = vmatmul.mubr.msk.bf16.vlgmr.msra.gmra.mxu0 %vm1098_vm4, %v1468_v17 }
 0xa3e   : > { %v1524_v27 = vpop.f32.mrf.mxu0 }
 0xa3f   : > { %v1525_v28 = vadd.f32 %v1991_v26, %v1524_v27 }
 0xa40   : > { %v2091_v29 = vpop.f32.mrf.mxu0 }
 0xa41   : > { %v1531_v30 = vmul.f32 0.70710677, %v1525_v28  ;;  %v1530_v55 = vmul.f32 0.5, %v1525_v28 }
 0xa42   : > { %v1527_v31 = vpop.f32.mrf.mxu0 }
 0xa43   : > { %v1532_v32 = vand.u32 2147483647, %v1531_v30  ;;  %vm1552_vm10 = vcmp.ge.f32.partialorder %v1531_v30, 0.0 }
 0xa44   : > { %v2092_v33 = vpop.f32.mrf.mxu0 }
 0xa45   : > { %v1533_v34 = vmul.f32 0.3275911, %v1532_v32  ;;  %v1546_v36 = vsub.f32 0.0, %v1532_v32 }
 0xa47   : > { %v1534_v35 = vadd.f32 1.0, %v1533_v34  ;;  %v1547_v37 = vmul.f32 %v1546_v36, %v1532_v32 }
 0xa49   : > { %2244 = vrcp.f32 %v1534_v35  ;;  %v1548_v40 = vmul.f32 1.442695, %v1547_v37 }
 0xa4b   : > { %2246 = vpow2.f32 %v1548_v40 }
 0xa56   : > { %v2245_v46 = vpop.eup %2244 }
 0xa57   : > { %v1537_v39 = vmul.f32 1.0614054, %v2245_v46 }
 0xa58   : > { %v2247_v50 = vpop.eup %2246 }
 0xa59   : > { %v1538_v41 = vadd.f32 -1.4531521, %v1537_v39 }
 0xa5b   : > { %v1539_v42 = vmul.f32 %v2245_v46, %v1538_v41 }
 0xa5d   : > { %v1540_v43 = vadd.f32 1.4214138, %v1539_v42 }
 0xa5f   : > { %v1541_v44 = vmul.f32 %v2245_v46, %v1540_v43 }
 0xa61   : > { %v1542_v45 = vadd.f32 -0.28449672, %v1541_v44 }
 0xa63   : > { %v1543_v47 = vmul.f32 %v2245_v46, %v1542_v45 }
 0xa65   : > { %v1544_v48 = vadd.f32 0.2548296, %v1543_v47 }
 0xa67   : > { %v1545_v49 = vmul.f32 %v2245_v46, %v1544_v48 }
 0xa69   : > { %v1550_v51 = vmul.f32 %v2247_v50, %v1545_v49 }
 0xa6b   : > { %v1551_v52 = vsub.f32 1.0, %v1550_v51 }
 0xa6d   : > { %v1553_v53 = vsub.f32 0.0, %v1551_v52 }
 0xa6f   : > { %v1554_v54 = vsel %vm1552_vm10, %v1551_v52, %v1553_v53 }
 0xa70   : > { %v1555_v56 = vadd.f32 1.0, %v1554_v54 }
 0xa72   : > { %v1556_v57 = vmul.f32 %v1555_v56, %v1530_v55 }
 0xa74   : > { %v1557_v58 = vpack.c.bf16 %v1556_v57, %v1556_v57 }
 0xa76   : > { %2110 = vmatmul.mubr.bf16.vlgmr.msra.gmra.mxu1 %v1557_v58 }
 0xb36   : > { %v1640_v60 = vpop.f32.mrf.mxu1 }
 0xb37   : > { %v1646_v61 = vadd.f32 %v1640_v60, %v2724_v62 }
 0xb38   : > { %v2111_v63 = vpop.f32.mrf.mxu1  ;;  %1658 = sbr.rel (%p2004_p1) target bundleno = 3541 (0xdd5), region = 108 }
 0xb39   : > { %v1653_v0 = vadd.f32 %v2003_v59, %v1646_v61 }
 0xb3a   : > { %v1643_v1 = vpop.f32.mrf.mxu1 }
 0xb3b   : > { %1654 = vst.msk [vmem:[#allocation2] sm:$0x1f] %vm1050_vm2, %v1653_v0 }
 0xb3c   : > { %v2112_v2 = vpop.f32.mrf.mxu1 }
 0xb3d   : > { %vm1665_vm11 = vcmask 253952   ;;  %v2248_v62 = vld [vmem:[%s2917_s23 + $0x8] sm:$0xff]   ;;  %v2358_v8 = vmov 0.0   ;;  %vm2359_vm12 = vmmov 0   ;;  %v2249_v9 = vld [vmem:[%s2918_s4] sm:$0xff]  }
 0xb3e   : > { %v1666_v3 = vsel %vm1665_vm11, %v1653_v0, 0.0  ;;  %2113 = vmatprep.subr.bf16.mxu0 %v2358_v8  ;;  %2117 = vmatprep.mubr.msk.bf16.mxu0 %vm2359_vm12, %v2358_v8  ;;  %v1659_v14 = vld [vmem:[%s2919_s26] sm:$0x1] }
 0xb3f   : > { %1667 = vadd.xlane.f32.xlu0 %v1666_v3  ;;  %2114 = vmatpush3.bf16.msra.mxu0 %v2248_v62  ;;  %v1660_v16 = vld [vmem:[%s2920_s6] sm:$0x1] }
 0xb40   : > { %2115 = vmatprep.subr.bf16.mxu0 %v2358_v8 }
 0xb43   : > { %2116 = vmatpush3.bf16.msra.mxu0 %v2249_v9 }
 0xbc8   : > { %v1668_v4 = vpop.xlane.xlu0 %1667 }
 0xbc9   : > { %v1669_v5 = vmul.f32 0.03125, %v1668_v4 }
 0xbcb   : > { %v1670_v6 = vsub.f32 %v1653_v0, %v1669_v5 }
 0xbcd   : > { %v1671_v38 = vmul.f32 %v1670_v6, %v1670_v6 }
 0xbcf   : > { %v1672_v7 = vsel %vm1665_vm11, %v1671_v38, 0.0 }
 0xbd0   : > { %1673 = vadd.xlane.f32.xlu0 %v1672_v7 }
 0xc59   : > { %v1674_v10 = vpop.xlane.xlu0 %1673 }
 0xc5a   : > { %v1675_v11 = vmul.f32 0.03125, %v1674_v10 }
 0xc5c   : > { %v1676_v12 = vadd.f32 1e-05, %v1675_v11 }
 0xc5e   : > { %2250 = vrsqrt.f32 %v1676_v12 }
 0xc6b   : > { %v2251_v13 = vpop.eup %2250 }
 0xc6c   : > { %v1678_v15 = vmul.f32 %v2251_v13, %v1670_v6 }
 0xc6e   : > { %v1679_v17 = vmul.f32 %v1678_v15, %v1659_v14 }
 0xc70   : > { %v1680_v18 = vadd.f32 %v1679_v17, %v1660_v16 }
 0xc72   : > { %v1681_v19 = vpack.c.bf16 %v1680_v18, %v1680_v18 }
 0xc74   : > { %2118 = vmatmul.mubr.msk.bf16.vlgmr.msra.gmra.mxu0 %vm1098_vm4, %v1681_v19 }
 0xd34   : > { %v1731_v20 = vpop.f32.mrf.mxu0 }
 0xd35   : > { %v1737_v21 = vmul.f32 %v1731_v20, %v1731_v20 }
 0xd36   : > { %v2119_v22 = vpop.f32.mrf.mxu0 }
 0xd37   : > { %v1738_v23 = vsel %vm1665_vm11, %v1737_v21, 0.0 }
 0xd38   : > { %1739 = vadd.xlane.f32.xlu1 %v1738_v23  ;;  %v1734_v24 = vpop.f32.mrf.mxu0 }
 0xd3a   : > { %v2120_v25 = vpop.f32.mrf.mxu0 }
 0xdc1   : > { %v1740_v26 = vpop.xlane.xlu1 %1739 }
 0xdc2   : > { %v1741_v27 = vadd.f32 1e-12, %v1740_v26 }
 0xdc4   : > { %2252 = vrsqrt.f32 %v1741_v27 }
 0xdd1   : > { %v2253_v28 = vpop.eup %2252 }
 0xdd2   : > { %v1743_v29 = vmul.f32 %v2253_v28, %v1731_v20 }
 0xdd4   : > { %1744 = vst.msk [vmem:[%s2603_s18] sm:$0x1] %vm1665_vm11, %v1743_v29 }
 0xdd5 PF: > { %s2921_s2 = sld [smem:[#allocation9_spill]]  ;;  %s1758_s1 = sshll.u32 %s2603_s18, 4  ;;  %s1759_s1 = int_to_ptr.vmem [resolvable:$true] %s1758_s1 }
 0xdd6   : > { %s2923_s29 = sld [smem:[#allocation29_spill]]  ;;  %s2924_s20 = sand.u32 1, %s2322_s22  }
 0xdd7   : > { %s1746_s23 = scalar_lea.sflag [#allocation4], %s2924_s20  ;;  %s2254_s19 = scalar_lea.vmem %s1759_s1, 16 }
 0xdd8   : > { %p2255_p2 = scmp.ne.s32.totalorder %s1759_s1, %s2254_s19  ;;  %s2360_s9 = smov [#allocation3]  }
 0xdd9   : > { %s2258_s27 = sshll.u32 %s2360_s9, 4  ;;  %s2259_s27 = int_to_ptr.vmem [resolvable:$false] %s2258_s27 }
 0xdda   : > { %p2256_p4 = pnand %p2255_p2, %p2515_p3  ;;  %s2260_s30 = scalar_lea.vmem %s2259_s27, 32 }
 0xddb   : > { %s2008_s7 = sshll.u32 %s2921_s2, 4  ;;  %p2261_p6 = scmp.lt.s32.totalorder %s1759_s1, %s2259_s27 }
 0xddc   : > { %s1756_s3 = scalar_lea.hbm %s2923_s29, %s2008_s7  ;;  %p2257_p5 = pneg %p2256_p4 }
 0xddd   : > { %p2262_p7 = scmp.lt.s32.totalorder %s2260_s30, %s2254_s19 }
 0xddf   : > { %p2263_p8 = por %p2262_p7, %p2261_p6 }
 0xde1   : > { %p2264_p10 = pnand %p2263_p8, %p2257_p5 }
 0xde3   : > { %2267 = shalt.err (!%p2264_p10)
}
 0xde4   : > { %s2268_s26 = scalar_lea.hbm %s1756_s3, 16  ;;  %s2272_s17 = scalar_lea.hbm %s2923_s29, 32 }
 0xde5   : > { %p2269_p11 = scmp.ne.s32.totalorder %s1756_s3, %s2268_s26  ;;  %p2273_p0 = scmp.lt.s32.totalorder %s1756_s3, %s2923_s29 }
 0xde6   : > { %p2274_p1 = scmp.lt.s32.totalorder %s2272_s17, %s2268_s26 }
 0xde7   : > { %p2270_p12 = pnand %p2269_p11, %p2515_p3 }
 0xde8   : > { %p2275_p2 = por %p2274_p1, %p2273_p0 }
 0xde9   : > { %p2271_p13 = pneg %p2270_p12 }
 0xdeb   : > { %p2276_p4 = pnand %p2275_p2, %p2271_p13 }
 0xded   : > { %2279 = shalt.err (!%p2276_p4)
}
 0xdee   : > { %2121 = dma.vmem_to_hbm [thread:$0]  (%p2515_p3), %s1759_s1, 16, %s1756_s3, %s1746_s23  }
 0xdef PF: > { %s2925_s7 = sld [smem:[#allocation12_spill]] }
 0xdf0   : > { %s2926_s25 = sld [smem:[#allocation6_spill]] }
 0xdf5   : > { %p2127_p5 = scmp.ge.s32.totalorder %s2925_s7, 2 }
 0xdf6   : > { %s1770_s20 = sand.u32 1, %s2926_s25  }
 0xdf7   : > { %p2124_p6 = pnand %p2127_p5, %p2525_p9  ;;  %s1771_s19 = scalar_lea.sflag [#allocation4], %s1770_s20 }
 0xdf9   : > { %p2125_p7 = pneg %p2124_p6 }
 0xdfb   : > { %2313 = dma.done.wait (%p2125_p7), %s1771_s19, 16  }
 0xdfc   : > { %2315 = vsyncadd (%p2125_p7), %s1771_s19, 4294967280  ;;  %s33_s26 = sadd.s32 1, %s2925_s7   ;;  %s2928_s9 = sld [smem:[#allocation7_spill]] }
 0xdfd   : > { %p30_p8 = scmp.ge.s32.totalorder %s33_s26, 6   ;;  %s2929_s23 = sld [smem:[#allocation17_spill]] }
 0xdfe   : > { %s2930_s24 = sld [smem:[#allocation10_spill]]  ;;  %s2934_s1 = smov %s2322_s22 }
 0xdff   : > { %s2931_s2 = sld [smem:[#allocation11_spill]]  ;;  %32 = sbr.rel (!%p30_p8) target bundleno = 18 (0x12), region = 179 }
 0xe00   : > { %s2932_s25 = sld [smem:[#allocation13_spill]] }
 0xe01   : > { %s2933_s3 = sld [smem:[#allocation15_spill]] }
 0xe02   : > { %s2935_s22 = smov %s2928_s9 }
 0xe04   :  { %1775 = vsyncpa [#allocation4], 1 }
 0xe05   :  { %1777 = vsyncpa [#allocation4 + $0x1], 1 }

</bundles_post_ra>
